<compile_context>
chip_gen: v6e
topology: v6e:2x2x1
jax: 0.10.0
libtpu: 0.0.40
codegen_flags: <defaults>
</compile_context>

<pallas_src>
import functools

import jax
import jax.numpy as jnp
from jax import lax
from jax.experimental import pallas as pl
from jax.experimental.pallas import tpu as pltpu

EPS = 1e-12                   # TransformBlock1d passes eps=EPS to BatchNorm1d
MXU_DTYPE = jnp.bfloat16      # matmul operand dtype (accumulation stays f32)


def _round_up(x, m):
    return ((x + m - 1) // m) * m


def _pick_row_block(rows):
    for cand in (512, 256, 128, 64, 32, 16, 8):
        if rows % cand == 0:
            return cand
    return rows  # full-extent fallback (always a legal block)


# ---------------------------------------------------------------------------
# Kernel 1: generic fused matmul
#   out[g] = act( (sum_k x_k @ w_k[g]) * scale[g] + shift[g] )
# ---------------------------------------------------------------------------
def fused_linear_kernel(*refs, n_parts, act):
    xs = refs[:n_parts]
    ws = refs[n_parts:2 * n_parts]
    scale_ref = refs[2 * n_parts]
    shift_ref = refs[2 * n_parts + 1]
    out_ref = refs[2 * n_parts + 2]

    acc = jnp.dot(xs[0][...].astype(MXU_DTYPE), ws[0][...],
                  preferred_element_type=jnp.float32)
    for k in range(1, n_parts):
        acc = acc + jnp.dot(xs[k][...].astype(MXU_DTYPE), ws[k][...],
                            preferred_element_type=jnp.float32)
    y = acc * scale_ref[...] + shift_ref[...]
    if act == "tanh":
        y = jnp.tanh(y)
    elif act == "relu":
        y = jnp.maximum(y, 0.0)
    out_ref[...] = y.astype(out_ref.dtype)


def fused_linear(x_parts, w_parts, scale, shift, act):
    """x_parts: list of entries, each either a 2-D (R, K) array or a tuple
    (3-D array (Gx, R, K), static leading index).  w_parts: list of (G, K, N).
    scale/shift: (G, N).  Returns (G, R, N) float32."""
    n_parts = len(x_parts)
    g = w_parts[0].shape[0]
    n_out = w_parts[0].shape[-1]

    def part_info(p):
        if isinstance(p, tuple):
            arr, lead = p
            return arr, arr.shape[-2], arr.shape[-1], lead
        return p, p.shape[0], p.shape[1], None

    rows = part_info(x_parts[0])[1]
    rb = _pick_row_block(rows)

    in_specs, args = [], []
    for p in x_parts:
        arr, r, k, lead = part_info(p)
        assert r == rows
        if lead is None:
            in_specs.append(pl.BlockSpec((rb, k), lambda gi, ri: (ri, 0)))
        else:
            in_specs.append(pl.BlockSpec(
                (None, rb, k), lambda gi, ri, lead=lead: (lead, ri, 0)))
        args.append(arr)
    for w in w_parts:
        kk, nn = w.shape[-2], w.shape[-1]
        in_specs.append(pl.BlockSpec((None, kk, nn), lambda gi, ri: (gi, 0, 0)))
        args.append(w)
    in_specs.append(pl.BlockSpec((None, 1, n_out), lambda gi, ri: (gi, 0, 0)))
    in_specs.append(pl.BlockSpec((None, 1, n_out), lambda gi, ri: (gi, 0, 0)))
    args.extend([scale.reshape(g, 1, n_out), shift.reshape(g, 1, n_out)])

    kernel = functools.partial(fused_linear_kernel, n_parts=n_parts, act=act)
    return pl.pallas_call(
        kernel,
        out_shape=jax.ShapeDtypeStruct((g, rows, n_out), jnp.float32),
        grid=(g, rows // rb),
        in_specs=in_specs,
        out_specs=pl.BlockSpec((None, rb, n_out), lambda gi, ri: (gi, ri, 0)),
        compiler_params=pltpu.CompilerParams(
            dimension_semantics=("parallel", "parallel")),
    )(*args)


# ---------------------------------------------------------------------------
# Kernel 2: bidirectional LSTM recurrence (input projection already done).
#   gx: (2, T_pad, B, 4H) pre-computed x_t @ W_ih + b (gate order i, f, g, o)
#   whh: (2, H, 4H);  out: (2, T_pad, B, H)
#   grid = (direction, time-chunk); h/c live in VMEM scratch across chunks.
# ---------------------------------------------------------------------------
def bilstm_kernel(gx_ref, whh_ref, out_ref, h_scr, c_scr, *, t_valid, tc_size):
    d = pl.program_id(0)          # 0 = forward, 1 = backward (time-reversed)
    ci = pl.program_id(1)         # chunk counter for this direction
    n_tc = pl.num_programs(1)

    @pl.when(ci == 0)
    def _():
        h_scr[...] = jnp.zeros_like(h_scr)
        c_scr[...] = jnp.zeros_like(c_scr)

    hd = whh_ref.shape[0]
    chunk = ci + d * (n_tc - 1 - 2 * ci)       # fwd: ci, bwd: n_tc-1-ci
    t_base = chunk * tc_size

    def step(s, carry):
        lt = s + d * (tc_size - 1 - 2 * s)     # fwd: s, bwd: tc_size-1-s
        gt = t_base + lt
        gx = gx_ref[lt]                        # (B, 4H) f32
        h = h_scr[...]
        c = c_scr[...]
        gates = gx + jnp.dot(h.astype(MXU_DTYPE), whh_ref[...],
                             preferred_element_type=jnp.float32)
        i_g = jax.nn.sigmoid(gates[:, 0 * hd:1 * hd])
        f_g = jax.nn.sigmoid(gates[:, 1 * hd:2 * hd])
        g_g = jnp.tanh(gates[:, 2 * hd:3 * hd])
        o_g = jax.nn.sigmoid(gates[:, 3 * hd:4 * hd])
        c_new = f_g * c + i_g * g_g
        h_new = o_g * jnp.tanh(c_new)
        valid = gt < t_valid                   # ignore padded time steps
        h_scr[...] = jnp.where(valid, h_new, h)
        c_scr[...] = jnp.where(valid, c_new, c)
        out_ref[lt] = h_new
        return carry

    lax.fori_loop(0, tc_size, step, 0)


def bilstm_layer(gx, whh, *, t_valid, tc_size):
    _, t_pad, bsz, h4 = gx.shape
    hd = h4 // 4
    n_tc = t_pad // tc_size
    kernel = functools.partial(bilstm_kernel, t_valid=t_valid, tc_size=tc_size)
    chunk_map = lambda d, c: (d, c + d * (n_tc - 1 - 2 * c), 0, 0)
    return pl.pallas_call(
        kernel,
        out_shape=jax.ShapeDtypeStruct((2, t_pad, bsz, hd), jnp.float32),
        grid=(2, n_tc),
        in_specs=[
            pl.BlockSpec((None, tc_size, bsz, h4), chunk_map),
            pl.BlockSpec((None, hd, h4), lambda d, c: (d, 0, 0)),
        ],
        out_specs=pl.BlockSpec((None, tc_size, bsz, hd), chunk_map),
        scratch_shapes=[pltpu.VMEM((bsz, hd), jnp.float32),
                        pltpu.VMEM((bsz, hd), jnp.float32)],
        compiler_params=pltpu.CompilerParams(
            dimension_semantics=("parallel", "arbitrary")),
    )(gx, whh)


# ---------------------------------------------------------------------------
# Kernel 3: mask * mixture (ReLU/affine_out already folded into net[1]).
# ---------------------------------------------------------------------------
def mask_mul_kernel(m_ref, x_ref, o_ref):
    o_ref[...] = m_ref[...] * x_ref[...]


def mask_mul(mask_bcft, x_bcft):
    bc, nb, t = mask_bcft.shape
    return pl.pallas_call(
        mask_mul_kernel,
        out_shape=jax.ShapeDtypeStruct((bc, nb, t), jnp.float32),
        grid=(bc,),
        in_specs=[pl.BlockSpec((None, nb, t), lambda i: (i, 0, 0)),
                  pl.BlockSpec((None, nb, t), lambda i: (i, 0, 0))],
        out_specs=pl.BlockSpec((None, nb, t), lambda i: (i, 0, 0)),
        compiler_params=pltpu.CompilerParams(dimension_semantics=("parallel",)),
    )(mask_bcft, x_bcft)


# ---------------------------------------------------------------------------
# Parameter packing: fold affine_in / eval-BN / affine_out into matmul
# scale+shift, pack LSTM gates, split net[0] for the concat-free skip.
# ---------------------------------------------------------------------------
def _bn_fold(bn, eps):
    s = bn["gamma"] / jnp.sqrt(bn["var"] + eps)
    return s, bn["beta"] - bn["mean"] * s


def pack_params(P, in_channels, hidden, n_bins, max_bin, eps):
    C = in_channels
    hd = hidden // 2

    # block: transform_affine_in folded into the weight / shift, then BN
    a = 1.0 / (jnp.abs(P["scale_in"]) + eps)            # (max_bin,)
    a_full = jnp.tile(a, C)                             # feature = c*max_bin + f
    c_full = jnp.tile(-P["bias_in"] * a, C)
    w_bt = P["block_w"].T                               # (C*max_bin, hidden)
    s_bn, sh_bn = _bn_fold(P["block_bn"], eps)
    block_w = (a_full[:, None] * w_bt).astype(MXU_DTYPE)[None]
    block_scale = s_bn[None]
    block_shift = (sh_bn + s_bn * (c_full @ w_bt))[None]

    # LSTM: gate-packed weights, fwd/bwd stacked on a leading direction axis
    lstm = []
    for li, layer in enumerate(P["lstm"]):
        wih_f, wih_b = layer["fwd"]["w_ih"].T, layer["bwd"]["w_ih"].T  # (Din,4H)
        whh_f, whh_b = layer["fwd"]["w_hh"].T, layer["bwd"]["w_hh"].T  # (H, 4H)
        b_f = layer["fwd"]["b_ih"] + layer["fwd"]["b_hh"]
        b_b = layer["bwd"]["b_ih"] + layer["bwd"]["b_hh"]
        if li == 0:
            wih_parts = [jnp.stack([wih_f, wih_b]).astype(MXU_DTYPE)]
        else:  # deeper layers consume [fwd_h | bwd_h]: split the K dimension
            wih_parts = [jnp.stack([wih_f[:hd], wih_b[:hd]]).astype(MXU_DTYPE),
                         jnp.stack([wih_f[hd:], wih_b[hd:]]).astype(MXU_DTYPE)]
        lstm.append(dict(
            wih_parts=wih_parts,
            gx_scale=jnp.ones((2, 4 * hd), jnp.float32),
            gx_shift=jnp.stack([b_f, b_b]),
            whh=jnp.stack([whh_f, whh_b]).astype(MXU_DTYPE),
        ))

    # net[0]: split so the [seq | rnn_fwd | rnn_bwd] concat is never built
    w0t = P["net0_w"].T                                  # (2*hidden, hidden)
    s0, sh0 = _bn_fold(P["net0_bn"], eps)
    net0_w_parts = [w0t[:hidden].astype(MXU_DTYPE)[None],
                    w0t[hidden:hidden + hd].astype(MXU_DTYPE)[None],
                    w0t[hidden + hd:].astype(MXU_DTYPE)[None]]

    # net[1]: BN + transform_affine_out folded into scale/shift
    w1t = P["net1_w"].T                                  # (hidden, C*n_bins)
    s1, sh1 = _bn_fold(P["net1_bn"], eps)
    so = jnp.tile(P["scale_out"], C)                     # feature = c*n_bins + k
    bo = jnp.tile(P["bias_out"], C)

    return dict(
        block_w=block_w, block_scale=block_scale, block_shift=block_shift,
        lstm=lstm,
        net0_w_parts=net0_w_parts, net0_scale=s0[None], net0_shift=sh0[None],
        net1_w=w1t.astype(MXU_DTYPE)[None],
        net1_scale=(so * s1)[None], net1_shift=(so * sh1 + bo)[None],
    )


# ---------------------------------------------------------------------------
# Full forward
# ---------------------------------------------------------------------------
@functools.partial(jax.jit, static_argnums=(2, 3, 4, 5))
def openunmix_forward_pallas(x, P, in_channels, hidden, n_bins, max_bin):
    eps = EPS
    B, C, _, T = x.shape
    hd = hidden // 2

    tc_size = 64 if T > 64 else _round_up(T, 8)
    t_pad = _round_up(T, tc_size)
    rows = t_pad * B

    prm = pack_params(P, C, hidden, n_bins, max_bin, eps)

    # crop to max_bin, (B,C,F,T) -> (T,B,C,F) -> (T*B, C*F), pad the time axis
    xr = jnp.transpose(x[:, :, :max_bin, :], (3, 0, 1, 2)).reshape(T * B,
                                                                   C * max_bin)
    if t_pad != T:
        xr = jnp.pad(xr, ((0, (t_pad - T) * B), (0, 0)))

    # affine_in + Linear(no bias) + BN(eval) + tanh, fused
    seq3 = fused_linear([xr], [prm["block_w"]], prm["block_scale"],
                        prm["block_shift"], act="tanh")      # (1, rows, hidden)

    # bidirectional LSTM stack: big input projection + packed-gate recurrence
    rnn = None
    for lp in prm["lstm"]:
        x_parts = [(seq3, 0)] if rnn is None else [(rnn, 0), (rnn, 1)]
        gx = fused_linear(x_parts, lp["wih_parts"], lp["gx_scale"],
                          lp["gx_shift"], act=None)          # (2, rows, 4*hd)
        out = bilstm_layer(gx.reshape(2, t_pad, B, 4 * hd), lp["whh"],
                           t_valid=T, tc_size=tc_size)       # (2, t_pad, B, hd)
        rnn = out.reshape(2, rows, hd)
        # eval mode: inter-layer dropout is a no-op

    # concat-free skip connection + net[0] (ReLU)
    y3 = fused_linear([(seq3, 0), (rnn, 0), (rnn, 1)], prm["net0_w_parts"],
                      prm["net0_scale"], prm["net0_shift"], act="relu")

    # net[1] + BN + transform_affine_out + ReLU  -> mask
    m3 = fused_linear([(y3, 0)], [prm["net1_w"]], prm["net1_scale"],
                      prm["net1_shift"], act="relu")         # (1, rows, C*n_bins)

    mask = m3.reshape(t_pad, B, C, n_bins)[:T]
    mask = jnp.transpose(mask, (1, 2, 3, 0))                 # (B, C, n_bins, T)
    out = mask_mul(mask.reshape(B * C, n_bins, T),
                   x.reshape(B * C, n_bins, T))
    return out.reshape(B, C, n_bins, T)


# ---------------------------------------------------------------------------
# Deterministic parameter init
# ---------------------------------------------------------------------------
def make_linear(key, d_out, d_in):
    return 0.1 * jax.random.normal(key, (d_out, d_in), jnp.float32)


def make_bn(key, d):
    k1, k2, k3, k4 = jax.random.split(key, 4)
    return dict(
        gamma=1.0 + 0.1 * jax.random.normal(k1, (d,), jnp.float32),
        beta=0.1 * jax.random.normal(k2, (d,), jnp.float32),
        mean=0.1 * jax.random.normal(k3, (d,), jnp.float32),
        var=jax.random.uniform(k4, (d,), jnp.float32, 0.5, 1.5),
    )


def make_lstm_dir(key, d_in, hd):
    k1, k2, k3, k4 = jax.random.split(key, 4)
    return dict(
        w_ih=0.1 * jax.random.normal(k1, (4 * hd, d_in), jnp.float32),
        w_hh=0.1 * jax.random.normal(k2, (4 * hd, hd), jnp.float32),
        b_ih=0.1 * jax.random.normal(k3, (4 * hd,), jnp.float32),
        b_hh=0.1 * jax.random.normal(k4, (4 * hd,), jnp.float32),
    )


def init_params(key, in_channels, hidden, num_layers, n_bins, max_bin):
    keys = jax.random.split(key, 16)
    hd = hidden // 2
    P = {
        # _reset_parameters(): scale filled with 1, bias zeroed
        "scale_in": jnp.ones((max_bin,), jnp.float32),
        "bias_in": jnp.zeros((max_bin,), jnp.float32),
        "scale_out": jnp.ones((n_bins,), jnp.float32),
        "bias_out": jnp.zeros((n_bins,), jnp.float32),
        "block_w": make_linear(keys[0], hidden, in_channels * max_bin),
        "block_bn": make_bn(keys[1], hidden),
        "net0_w": make_linear(keys[2], hidden, 2 * hidden),
        "net0_bn": make_bn(keys[3], hidden),
        "net1_w": make_linear(keys[4], in_channels * n_bins, hidden),
        "net1_bn": make_bn(keys[5], in_channels * n_bins),
    }
    lstm = []
    for l in range(num_layers):
        d_in = hidden if l == 0 else 2 * hd
        lstm.append({"fwd": make_lstm_dir(keys[6 + 2 * l], d_in, hd),
                     "bwd": make_lstm_dir(keys[7 + 2 * l], d_in, hd)})
    P["lstm"] = lstm
    return P


# ---------------------------------------------------------------------------
# Pure-JAX float32 reference (mirrors PyTorch eval-mode forward)
# ---------------------------------------------------------------------------
def lstm_dir_ref(x_btd, p, hd, reverse):
    B, T, _ = x_btd.shape
    h = jnp.zeros((B, hd), jnp.float32)
    c = jnp.zeros((B, hd), jnp.float32)
    outs = [None] * T
    order = range(T - 1, -1, -1) if reverse else range(T)
    b = p["b_ih"] + p["b_hh"]
    for t in order:
        gates = x_btd[:, t] @ p["w_ih"].T + h @ p["w_hh"].T + b
        i = jax.nn.sigmoid(gates[:, :hd])
        f = jax.nn.sigmoid(gates[:, hd:2 * hd])
        g = jnp.tanh(gates[:, 2 * hd:3 * hd])
        o = jax.nn.sigmoid(gates[:, 3 * hd:])
        c = f * c + i * g
        h = o * jnp.tanh(c)
        outs[t] = h
    return jnp.stack(outs, axis=1)


def reference_forward(x, P, in_channels, hidden, n_bins, max_bin, eps=EPS):
    B, C, _, T = x.shape
    hd = hidden // 2
    x_valid = x[:, :, :max_bin, :]
    x_aff = (x_valid - P["bias_in"][None, None, :, None]) / (
        jnp.abs(P["scale_in"][None, None, :, None]) + eps)
    xr = jnp.transpose(x_aff, (0, 3, 1, 2)).reshape(B * T, C * max_bin)

    def block(x2d, w, bn, act):
        y = x2d @ w.T
        y = bn["gamma"] * (y - bn["mean"]) / jnp.sqrt(bn["var"] + eps) + bn["beta"]
        if act == "tanh":
            y = jnp.tanh(y)
        elif act == "relu":
            y = jnp.maximum(y, 0.0)
        return y

    h0 = block(xr, P["block_w"], P["block_bn"], "tanh")
    seq = h0.reshape(B, T, hidden)
    x_cur = seq
    for layer in P["lstm"]:
        fw = lstm_dir_ref(x_cur, layer["fwd"], hd, reverse=False)
        bw = lstm_dir_ref(x_cur, layer["bwd"], hd, reverse=True)
        x_cur = jnp.concatenate([fw, bw], axis=-1)
    cat = jnp.concatenate([seq, x_cur], axis=2).reshape(B * T, 2 * hidden)
    y = block(cat, P["net0_w"], P["net0_bn"], "relu")
    y = block(y, P["net1_w"], P["net1_bn"], None)
    y = y.reshape(B, T, C, n_bins).transpose(0, 2, 3, 1)
    y = P["scale_out"][None, None, :, None] * y + P["bias_out"][None, None, :, None]
    return jnp.maximum(y, 0.0) * x


# ---------------------------------------------------------------------------
if __name__ == "__main__":
    # small OpenUnmix config: in_channels=2, hidden=32, 2 LSTM layers,
    # n_bins=24, max_bin=16; input (batch, channels, n_bins, n_frames)
    B, C, n_bins, n_frames = 2, 2, 24, 8
    max_bin, hidden, num_layers = 16, 32, 2

    key = jax.random.PRNGKey(0)
    kx, kp = jax.random.split(key)
    # amplitude spectrogram (non-negative)
    x = jnp.abs(jax.random.normal(kx, (B, C, n_bins, n_frames), jnp.float32))

    P = init_params(kp, C, hidden, num_layers, n_bins, max_bin)

    out = openunmix_forward_pallas(x, P, C, hidden, n_bins, max_bin)
    out = jax.block_until_ready(out)

    ref = reference_forward(x, P, C, hidden, n_bins, max_bin)
    err = float(jnp.max(jnp.abs(out - ref)))
    scale = float(jnp.max(jnp.abs(ref)))
    tol = 5e-2 * max(1.0, scale)   # bf16 MXU operands vs full-f32 reference
    if out.shape != x.shape or not bool(jnp.all(jnp.isfinite(out))) or err > tol:
        raise SystemExit("mismatch: max_abs_err=%g (tol=%g)" % (err, tol))
    print("KERNEL_OK")
</pallas_src>

<mosaic_0001>
module attributes {stable_mosaic.version = 11 : i64} {
  func.func @fused_linear_kernel(%arg0: i32, %arg1: i32, %arg2: memref<16x32xf32, #tpu.memory_space<vmem>>, %arg3: memref<1x32x32xbf16, #tpu.memory_space<vmem>>, %arg4: memref<1x1x32xf32, #tpu.memory_space<vmem>>, %arg5: memref<1x1x32xf32, #tpu.memory_space<vmem>>, %arg6: memref<1x16x32xf32, #tpu.memory_space<vmem>>) attributes {dimension_semantics = [#tpu.dimension_semantics<parallel>, #tpu.dimension_semantics<parallel>], iteration_bounds = array<i64: 1, 1>, scalar_prefetch = 0 : i64, scratch_operands = 0 : i64, tpu.core_type = #tpu.core_type<tc>, window_params = [{transform_indices = @transform_0, window_bounds = array<i64: 16, 32>}, {transform_indices = @transform_1, window_bounds = array<i64: 1, 32, 32>}, {transform_indices = @transform_2, window_bounds = array<i64: 1, 1, 32>}, {transform_indices = @transform_3, window_bounds = array<i64: 1, 1, 32>}, {transform_indices = @transform_4, window_bounds = array<i64: 1, 16, 32>}]} {
    %c0 = arith.constant 0 : index
    %c0_0 = arith.constant 0 : index
    %0 = vector.load %arg2[%c0, %c0_0] : memref<16x32xf32, #tpu.memory_space<vmem>>, vector<16x32xf32>
    %1 = arith.truncf %0 : vector<16x32xf32> to vector<16x32xbf16>
    %c0_1 = arith.constant 0 : index
    %c0_2 = arith.constant 0 : index
    %c0_3 = arith.constant 0 : index
    %2 = vector.load %arg3[%c0_1, %c0_2, %c0_3] : memref<1x32x32xbf16, #tpu.memory_space<vmem>>, vector<1x32x32xbf16>
    %3 = vector.shape_cast %2 : vector<1x32x32xbf16> to vector<32x32xbf16>
    %cst = arith.constant dense<0.000000e+00> : vector<16x32xf32>
    %4 = tpu.matmul %1, %3, %cst {dimension_numbers = #tpu.dot_dimension_numbers<[1], [0], [0], [1], [0, 0, 1, 1], [], []>} : vector<16x32xbf16>, vector<32x32xbf16>, vector<16x32xf32> -> vector<16x32xf32>
    %c0_4 = arith.constant 0 : index
    %c0_5 = arith.constant 0 : index
    %c0_6 = arith.constant 0 : index
    %5 = vector.load %arg4[%c0_4, %c0_5, %c0_6] : memref<1x1x32xf32, #tpu.memory_space<vmem>>, vector<1x1x32xf32>
    %6 = vector.shape_cast %5 : vector<1x1x32xf32> to vector<1x32xf32>
    %7 = vector.broadcast %6 : vector<1x32xf32> to vector<16x32xf32>
    %8 = arith.mulf %4, %7 : vector<16x32xf32>
    %c0_7 = arith.constant 0 : index
    %c0_8 = arith.constant 0 : index
    %c0_9 = arith.constant 0 : index
    %9 = vector.load %arg5[%c0_7, %c0_8, %c0_9] : memref<1x1x32xf32, #tpu.memory_space<vmem>>, vector<1x1x32xf32>
    %10 = vector.shape_cast %9 : vector<1x1x32xf32> to vector<1x32xf32>
    %11 = vector.broadcast %10 : vector<1x32xf32> to vector<16x32xf32>
    %12 = arith.addf %8, %11 : vector<16x32xf32>
    %13 = math.tanh %12 : vector<16x32xf32>
    %c0_10 = arith.constant 0 : index
    %c0_11 = arith.constant 0 : index
    %c0_12 = arith.constant 0 : index
    %14 = vector.load %arg6[%c0_10, %c0_11, %c0_12] : memref<1x16x32xf32, #tpu.memory_space<vmem>>, vector<1x16x32xf32>
    %15 = vector.shape_cast %14 : vector<1x16x32xf32> to vector<16x32xf32>
    %16 = vector.shape_cast %13 : vector<16x32xf32> to vector<1x16x32xf32>
    tpu.vector_store %arg6[%c0_10, %c0_11, %c0_12], %16 {strides = array<i32>} : memref<1x16x32xf32, #tpu.memory_space<vmem>>, vector<1x16x32xf32>,
    return
  }
  func.func @transform_0(%arg0: i32, %arg1: i32) -> (i32, i32) {
    %c0_i32 = arith.constant 0 : i32
    %c0_i32_0 = arith.constant 0 : i32
    return %arg1, %c0_i32 : i32, i32
  }
  func.func @transform_1(%arg0: i32, %arg1: i32) -> (i32, i32, i32) {
    %c0_i32 = arith.constant 0 : i32
    %c0_i32_0 = arith.constant 0 : i32
    %c0_i32_1 = arith.constant 0 : i32
    return %arg0, %c0_i32, %c0_i32_0 : i32, i32, i32
  }
  func.func @transform_2(%arg0: i32, %arg1: i32) -> (i32, i32, i32) {
    %c0_i32 = arith.constant 0 : i32
    %c0_i32_0 = arith.constant 0 : i32
    %c0_i32_1 = arith.constant 0 : i32
    return %arg0, %c0_i32, %c0_i32_0 : i32, i32, i32
  }
  func.func @transform_3(%arg0: i32, %arg1: i32) -> (i32, i32, i32) {
    %c0_i32 = arith.constant 0 : i32
    %c0_i32_0 = arith.constant 0 : i32
    %c0_i32_1 = arith.constant 0 : i32
    return %arg0, %c0_i32, %c0_i32_0 : i32, i32, i32
  }
  func.func @transform_4(%arg0: i32, %arg1: i32) -> (i32, i32, i32) {
    %c0_i32 = arith.constant 0 : i32
    %c0_i32_0 = arith.constant 0 : i32
    return %arg0, %arg1, %c0_i32 : i32, i32, i32
  }
}

module attributes {stable_mosaic.version = 11 : i64} {
  func.func @fused_linear_kernel(%arg0: i32, %arg1: i32, %arg2: memref<1x16x16xf32, #tpu.memory_space<vmem>>, %arg3: memref<1x16x16xf32, #tpu.memory_space<vmem>>, %arg4: memref<1x16x64xbf16, #tpu.memory_space<vmem>>, %arg5: memref<1x16x64xbf16, #tpu.memory_space<vmem>>, %arg6: memref<1x1x64xf32, #tpu.memory_space<vmem>>, %arg7: memref<1x1x64xf32, #tpu.memory_space<vmem>>, %arg8: memref<1x16x64xf32, #tpu.memory_space<vmem>>) attributes {dimension_semantics = [#tpu.dimension_semantics<parallel>, #tpu.dimension_semantics<parallel>], iteration_bounds = array<i64: 2, 1>, scalar_prefetch = 0 : i64, scratch_operands = 0 : i64, tpu.core_type = #tpu.core_type<tc>, window_params = [{transform_indices = @transform_0, window_bounds = array<i64: 1, 16, 16>}, {transform_indices = @transform_1, window_bounds = array<i64: 1, 16, 16>}, {transform_indices = @transform_2, window_bounds = array<i64: 1, 16, 64>}, {transform_indices = @transform_3, window_bounds = array<i64: 1, 16, 64>}, {transform_indices = @transform_4, window_bounds = array<i64: 1, 1, 64>}, {transform_indices = @transform_5, window_bounds = array<i64: 1, 1, 64>}, {transform_indices = @transform_6, window_bounds = array<i64: 1, 16, 64>}]} {
    %c0 = arith.constant 0 : index
    %c0_0 = arith.constant 0 : index
    %c0_1 = arith.constant 0 : index
    %0 = vector.load %arg2[%c0, %c0_0, %c0_1] : memref<1x16x16xf32, #tpu.memory_space<vmem>>, vector<1x16x16xf32>
    %1 = vector.shape_cast %0 : vector<1x16x16xf32> to vector<16x16xf32>
    %2 = arith.truncf %1 : vector<16x16xf32> to vector<16x16xbf16>
    %c0_2 = arith.constant 0 : index
    %c0_3 = arith.constant 0 : index
    %c0_4 = arith.constant 0 : index
    %3 = vector.load %arg4[%c0_2, %c0_3, %c0_4] : memref<1x16x64xbf16, #tpu.memory_space<vmem>>, vector<1x16x64xbf16>
    %4 = vector.shape_cast %3 : vector<1x16x64xbf16> to vector<16x64xbf16>
    %cst = arith.constant dense<0.000000e+00> : vector<16x64xf32>
    %5 = tpu.matmul %2, %4, %cst {dimension_numbers = #tpu.dot_dimension_numbers<[1], [0], [0], [1], [0, 0, 1, 1], [], []>} : vector<16x16xbf16>, vector<16x64xbf16>, vector<16x64xf32> -> vector<16x64xf32>
    %c0_5 = arith.constant 0 : index
    %c0_6 = arith.constant 0 : index
    %c0_7 = arith.constant 0 : index
    %6 = vector.load %arg3[%c0_5, %c0_6, %c0_7] : memref<1x16x16xf32, #tpu.memory_space<vmem>>, vector<1x16x16xf32>
    %7 = vector.shape_cast %6 : vector<1x16x16xf32> to vector<16x16xf32>
    %8 = arith.truncf %7 : vector<16x16xf32> to vector<16x16xbf16>
    %c0_8 = arith.constant 0 : index
    %c0_9 = arith.constant 0 : index
    %c0_10 = arith.constant 0 : index
    %9 = vector.load %arg5[%c0_8, %c0_9, %c0_10] : memref<1x16x64xbf16, #tpu.memory_space<vmem>>, vector<1x16x64xbf16>
    %10 = vector.shape_cast %9 : vector<1x16x64xbf16> to vector<16x64xbf16>
    %cst_11 = arith.constant dense<0.000000e+00> : vector<16x64xf32>
    %11 = tpu.matmul %8, %10, %cst_11 {dimension_numbers = #tpu.dot_dimension_numbers<[1], [0], [0], [1], [0, 0, 1, 1], [], []>} : vector<16x16xbf16>, vector<16x64xbf16>, vector<16x64xf32> -> vector<16x64xf32>
    %12 = arith.addf %5, %11 : vector<16x64xf32>
    %c0_12 = arith.constant 0 : index
    %c0_13 = arith.constant 0 : index
    %c0_14 = arith.constant 0 : index
    %13 = vector.load %arg6[%c0_12, %c0_13, %c0_14] : memref<1x1x64xf32, #tpu.memory_space<vmem>>, vector<1x1x64xf32>
    %14 = vector.shape_cast %13 : vector<1x1x64xf32> to vector<1x64xf32>
    %15 = vector.broadcast %14 : vector<1x64xf32> to vector<16x64xf32>
    %16 = arith.mulf %12, %15 : vector<16x64xf32>
    %c0_15 = arith.constant 0 : index
    %c0_16 = arith.constant 0 : index
    %c0_17 = arith.constant 0 : index
    %17 = vector.load %arg7[%c0_15, %c0_16, %c0_17] : memref<1x1x64xf32, #tpu.memory_space<vmem>>, vector<1x1x64xf32>
    %18 = vector.shape_cast %17 : vector<1x1x64xf32> to vector<1x64xf32>
    %19 = vector.broadcast %18 : vector<1x64xf32> to vector<16x64xf32>
    %20 = arith.addf %16, %19 : vector<16x64xf32>
    %c0_18 = arith.constant 0 : index
    %c0_19 = arith.constant 0 : index
    %c0_20 = arith.constant 0 : index
    %21 = vector.load %arg8[%c0_18, %c0_19, %c0_20] : memref<1x16x64xf32, #tpu.memory_space<vmem>>, vector<1x16x64xf32>
    %22 = vector.shape_cast %21 : vector<1x16x64xf32> to vector<16x64xf32>
    %23 = vector.shape_cast %20 : vector<16x64xf32> to vector<1x16x64xf32>
    tpu.vector_store %arg8[%c0_18, %c0_19, %c0_20], %23 {strides = array<i32>} : memref<1x16x64xf32, #tpu.memory_space<vmem>>, vector<1x16x64xf32>,
    return
  }
  func.func @transform_0(%arg0: i32, %arg1: i32) -> (i32, i32, i32) {
    %c0_i32 = arith.constant 0 : i32
    %c0_i32_0 = arith.constant 0 : i32
    %c0_i32_1 = arith.constant 0 : i32
    return %c0_i32, %arg1, %c0_i32_0 : i32, i32, i32
  }
  func.func @transform_1(%arg0: i32, %arg1: i32) -> (i32, i32, i32) {
    %c1_i32 = arith.constant 1 : i32
    %c0_i32 = arith.constant 0 : i32
    %c0_i32_0 = arith.constant 0 : i32
    return %c1_i32, %arg1, %c0_i32 : i32, i32, i32
  }
  func.func @transform_2(%arg0: i32, %arg1: i32) -> (i32, i32, i32) {
    %c0_i32 = arith.constant 0 : i32
    %c0_i32_0 = arith.constant 0 : i32
    %c0_i32_1 = arith.constant 0 : i32
    return %arg0, %c0_i32, %c0_i32_0 : i32, i32, i32
  }
  func.func @transform_3(%arg0: i32, %arg1: i32) -> (i32, i32, i32) {
    %c0_i32 = arith.constant 0 : i32
    %c0_i32_0 = arith.constant 0 : i32
    %c0_i32_1 = arith.constant 0 : i32
    return %arg0, %c0_i32, %c0_i32_0 : i32, i32, i32
  }
  func.func @transform_4(%arg0: i32, %arg1: i32) -> (i32, i32, i32) {
    %c0_i32 = arith.constant 0 : i32
    %c0_i32_0 = arith.constant 0 : i32
    %c0_i32_1 = arith.constant 0 : i32
    return %arg0, %c0_i32, %c0_i32_0 : i32, i32, i32
  }
  func.func @transform_5(%arg0: i32, %arg1: i32) -> (i32, i32, i32) {
    %c0_i32 = arith.constant 0 : i32
    %c0_i32_0 = arith.constant 0 : i32
    %c0_i32_1 = arith.constant 0 : i32
    return %arg0, %c0_i32, %c0_i32_0 : i32, i32, i32
  }
  func.func @transform_6(%arg0: i32, %arg1: i32) -> (i32, i32, i32) {
    %c0_i32 = arith.constant 0 : i32
    %c0_i32_0 = arith.constant 0 : i32
    return %arg0, %arg1, %c0_i32 : i32, i32, i32
  }
}

module attributes {stable_mosaic.version = 11 : i64} {
  func.func @bilstm_kernel(%arg0: i32, %arg1: i32, %arg2: memref<1x8x2x64xf32, #tpu.memory_space<vmem>>, %arg3: memref<1x16x64xbf16, #tpu.memory_space<vmem>>, %arg4: memref<1x8x2x16xf32, #tpu.memory_space<vmem>>, %arg5: memref<2x16xf32, #tpu.memory_space<vmem>>, %arg6: memref<2x16xf32, #tpu.memory_space<vmem>>) attributes {dimension_semantics = [#tpu.dimension_semantics<parallel>, #tpu.dimension_semantics<arbitrary>], iteration_bounds = array<i64: 2, 1>, scalar_prefetch = 0 : i64, scratch_operands = 2 : i64, tpu.core_type = #tpu.core_type<tc>, window_params = [{transform_indices = @transform_0, window_bounds = array<i64: 1, 8, 2, 64>}, {transform_indices = @transform_1, window_bounds = array<i64: 1, 16, 64>}, {transform_indices = @transform_2, window_bounds = array<i64: 1, 8, 2, 16>}]} {
    %c0_i32 = arith.constant 0 : i32
    %0 = arith.cmpi eq, %arg1, %c0_i32 : i32
    %1 = arith.extui %0 : i1 to i32
    %c0_i32_0 = arith.constant 0 : i32
    %2 = arith.cmpi ne, %1, %c0_i32_0 : i32
    scf.if %2 {
      %cst = arith.constant 0.000000e+00 : f32
      %9 = vector.broadcast %cst : f32 to vector<2x16xf32>
      %c0 = arith.constant 0 : index
      %c0_5 = arith.constant 0 : index
      %10 = vector.load %arg5[%c0, %c0_5] : memref<2x16xf32, #tpu.memory_space<vmem>>, vector<2x16xf32>
      tpu.vector_store %arg5[%c0, %c0_5], %9 {strides = array<i32>} : memref<2x16xf32, #tpu.memory_space<vmem>>, vector<2x16xf32>,
      %cst_6 = arith.constant 0.000000e+00 : f32
      %11 = vector.broadcast %cst_6 : f32 to vector<2x16xf32>
      %c0_7 = arith.constant 0 : index
      %c0_8 = arith.constant 0 : index
      %12 = vector.load %arg6[%c0_7, %c0_8] : memref<2x16xf32, #tpu.memory_space<vmem>>, vector<2x16xf32>
      tpu.vector_store %arg6[%c0_7, %c0_8], %11 {strides = array<i32>} : memref<2x16xf32, #tpu.memory_space<vmem>>, vector<2x16xf32>,
    } else {
    }
    %c2_i32 = arith.constant 2 : i32
    %3 = arith.muli %c2_i32, %arg1 : i32
    %c0_i32_1 = arith.constant 0 : i32
    %4 = arith.subi %c0_i32_1, %3 : i32
    %5 = arith.muli %arg0, %4 : i32
    %6 = arith.addi %arg1, %5 : i32
    %c8_i32 = arith.constant 8 : i32
    %7 = arith.muli %6, %c8_i32 : i32
    %c0_i32_2 = arith.constant 0 : i32
    %c8_i32_3 = arith.constant 8 : i32
    %8 = arith.addi %c0_i32_2, %c8_i32_3 : i32
    %c1_i32 = arith.constant 1 : i32
    scf.for %arg7 = %c0_i32_2 to %8 step %c1_i32  : i32 {
      %c2_i32_5 = arith.constant 2 : i32
      %9 = arith.muli %c2_i32_5, %arg7 : i32
      %c7_i32 = arith.constant 7 : i32
      %10 = arith.subi %c7_i32, %9 : i32
      %11 = arith.muli %arg0, %10 : i32
      %12 = arith.addi %arg7, %11 : i32
      %13 = arith.addi %7, %12 : i32
      %c0 = arith.constant 0 : index
      %14 = arith.index_cast %12 : i32 to index
      %c0_6 = arith.constant 0 : index
      %c0_7 = arith.constant 0 : index
      %15 = vector.load %arg2[%c0, %14, %c0_6, %c0_7] : memref<1x8x2x64xf32, #tpu.memory_space<vmem>>, vector<1x1x2x64xf32>
      %16 = vector.shape_cast %15 : vector<1x1x2x64xf32> to vector<2x64xf32>
      %c0_8 = arith.constant 0 : index
      %c0_9 = arith.constant 0 : index
      %17 = vector.load %arg5[%c0_8, %c0_9] : memref<2x16xf32, #tpu.memory_space<vmem>>, vector<2x16xf32>
      %c0_10 = arith.constant 0 : index
      %c0_11 = arith.constant 0 : index
      %18 = vector.load %arg6[%c0_10, %c0_11] : memref<2x16xf32, #tpu.memory_space<vmem>>, vector<2x16xf32>
      %19 = arith.truncf %17 : vector<2x16xf32> to vector<2x16xbf16>
      %c0_12 = arith.constant 0 : index
      %c0_13 = arith.constant 0 : index
      %c0_14 = arith.constant 0 : index
      %20 = vector.load %arg3[%c0_12, %c0_13, %c0_14] : memref<1x16x64xbf16, #tpu.memory_space<vmem>>, vector<1x16x64xbf16>
      %21 = vector.shape_cast %20 : vector<1x16x64xbf16> to vector<16x64xbf16>
      %cst = arith.constant dense<0.000000e+00> : vector<2x64xf32>
      %22 = tpu.matmul %19, %21, %cst {dimension_numbers = #tpu.dot_dimension_numbers<[1], [0], [0], [1], [0, 0, 1, 1], [], []>} : vector<2x16xbf16>, vector<16x64xbf16>, vector<2x64xf32> -> vector<2x64xf32>
      %23 = arith.addf %16, %22 : vector<2x64xf32>
      %24 = vector.extract_strided_slice %23 {offsets = [0, 0], sizes = [2, 16], strides = [1, 1]} : vector<2x64xf32> to vector<2x16xf32>
      %25 = arith.negf %24 : vector<2x16xf32>
      %26 = math.exp %25 : vector<2x16xf32>
      %cst_15 = arith.constant 1.000000e+00 : f32
      %27 = vector.broadcast %cst_15 : f32 to vector<2x16xf32>
      %28 = arith.addf %27, %26 : vector<2x16xf32>
      %29 = arith.divf %27, %28 : vector<2x16xf32>
      %30 = vector.extract_strided_slice %23 {offsets = [0, 16], sizes = [2, 16], strides = [1, 1]} : vector<2x64xf32> to vector<2x16xf32>
      %31 = arith.negf %30 : vector<2x16xf32>
      %32 = math.exp %31 : vector<2x16xf32>
      %cst_16 = arith.constant 1.000000e+00 : f32
      %33 = vector.broadcast %cst_16 : f32 to vector<2x16xf32>
      %34 = arith.addf %33, %32 : vector<2x16xf32>
      %35 = arith.divf %33, %34 : vector<2x16xf32>
      %36 = vector.extract_strided_slice %23 {offsets = [0, 32], sizes = [2, 16], strides = [1, 1]} : vector<2x64xf32> to vector<2x16xf32>
      %37 = math.tanh %36 : vector<2x16xf32>
      %38 = vector.extract_strided_slice %23 {offsets = [0, 48], sizes = [2, 16], strides = [1, 1]} : vector<2x64xf32> to vector<2x16xf32>
      %39 = arith.negf %38 : vector<2x16xf32>
      %40 = math.exp %39 : vector<2x16xf32>
      %cst_17 = arith.constant 1.000000e+00 : f32
      %41 = vector.broadcast %cst_17 : f32 to vector<2x16xf32>
      %42 = arith.addf %41, %40 : vector<2x16xf32>
      %43 = arith.divf %41, %42 : vector<2x16xf32>
      %44 = arith.mulf %35, %18 : vector<2x16xf32>
      %45 = arith.mulf %29, %37 : vector<2x16xf32>
      %46 = arith.addf %44, %45 : vector<2x16xf32>
      %47 = math.tanh %46 : vector<2x16xf32>
      %48 = arith.mulf %43, %47 : vector<2x16xf32>
      %c8_i32_18 = arith.constant 8 : i32
      %49 = arith.cmpi slt, %13, %c8_i32_18 : i32
      %50 = arith.select %49, %48, %17 : vector<2x16xf32>
      %c0_19 = arith.constant 0 : index
      %c0_20 = arith.constant 0 : index
      %51 = vector.load %arg5[%c0_19, %c0_20] : memref<2x16xf32, #tpu.memory_space<vmem>>, vector<2x16xf32>
      tpu.vector_store %arg5[%c0_19, %c0_20], %50 {strides = array<i32>} : memref<2x16xf32, #tpu.memory_space<vmem>>, vector<2x16xf32>,
      %52 = arith.select %49, %46, %18 : vector<2x16xf32>
      %c0_21 = arith.constant 0 : index
      %c0_22 = arith.constant 0 : index
      %53 = vector.load %arg6[%c0_21, %c0_22] : memref<2x16xf32, #tpu.memory_space<vmem>>, vector<2x16xf32>
      tpu.vector_store %arg6[%c0_21, %c0_22], %52 {strides = array<i32>} : memref<2x16xf32, #tpu.memory_space<vmem>>, vector<2x16xf32>,
      %c0_23 = arith.constant 0 : index
      %54 = arith.index_cast %12 : i32 to index
      %c0_24 = arith.constant 0 : index
      %c0_25 = arith.constant 0 : index
      %55 = vector.load %arg4[%c0_23, %54, %c0_24, %c0_25] : memref<1x8x2x16xf32, #tpu.memory_space<vmem>>, vector<1x1x2x16xf32>
      %56 = vector.shape_cast %55 : vector<1x1x2x16xf32> to vector<2x16xf32>
      %57 = vector.shape_cast %48 : vector<2x16xf32> to vector<1x1x2x16xf32>
      tpu.vector_store %arg4[%c0_23, %54, %c0_24, %c0_25], %57 {strides = array<i32>} : memref<1x8x2x16xf32, #tpu.memory_space<vmem>>, vector<1x1x2x16xf32>,
    }
    %c8_i32_4 = arith.constant 8 : i32
    return
  }
  func.func @transform_0(%arg0: i32, %arg1: i32) -> (i32, i32, i32, i32) {
    %c2_i32 = arith.constant 2 : i32
    %0 = arith.muli %c2_i32, %arg1 : i32
    %c0_i32 = arith.constant 0 : i32
    %1 = arith.subi %c0_i32, %0 : i32
    %2 = arith.muli %arg0, %1 : i32
    %3 = arith.addi %arg1, %2 : i32
    %c0_i32_0 = arith.constant 0 : i32
    %c0_i32_1 = arith.constant 0 : i32
    %c0_i32_2 = arith.constant 0 : i32
    return %arg0, %3, %c0_i32_0, %c0_i32_1 : i32, i32, i32, i32
  }
  func.func @transform_1(%arg0: i32, %arg1: i32) -> (i32, i32, i32) {
    %c0_i32 = arith.constant 0 : i32
    %c0_i32_0 = arith.constant 0 : i32
    %c0_i32_1 = arith.constant 0 : i32
    return %arg0, %c0_i32, %c0_i32_0 : i32, i32, i32
  }
  func.func @transform_2(%arg0: i32, %arg1: i32) -> (i32, i32, i32, i32) {
    %c2_i32 = arith.constant 2 : i32
    %0 = arith.muli %c2_i32, %arg1 : i32
    %c0_i32 = arith.constant 0 : i32
    %1 = arith.subi %c0_i32, %0 : i32
    %2 = arith.muli %arg0, %1 : i32
    %3 = arith.addi %arg1, %2 : i32
    %c0_i32_0 = arith.constant 0 : i32
    %c0_i32_1 = arith.constant 0 : i32
    %c0_i32_2 = arith.constant 0 : i32
    return %arg0, %3, %c0_i32_0, %c0_i32_1 : i32, i32, i32, i32
  }
}

module attributes {stable_mosaic.version = 11 : i64} {
  func.func @fused_linear_kernel(%arg0: i32, %arg1: i32, %arg2: memref<1x16x32xf32, #tpu.memory_space<vmem>>, %arg3: memref<1x32x64xbf16, #tpu.memory_space<vmem>>, %arg4: memref<1x1x64xf32, #tpu.memory_space<vmem>>, %arg5: memref<1x1x64xf32, #tpu.memory_space<vmem>>, %arg6: memref<1x16x64xf32, #tpu.memory_space<vmem>>) attributes {dimension_semantics = [#tpu.dimension_semantics<parallel>, #tpu.dimension_semantics<parallel>], iteration_bounds = array<i64: 2, 1>, scalar_prefetch = 0 : i64, scratch_operands = 0 : i64, tpu.core_type = #tpu.core_type<tc>, window_params = [{transform_indices = @transform_0, window_bounds = array<i64: 1, 16, 32>}, {transform_indices = @transform_1, window_bounds = array<i64: 1, 32, 64>}, {transform_indices = @transform_2, window_bounds = array<i64: 1, 1, 64>}, {transform_indices = @transform_3, window_bounds = array<i64: 1, 1, 64>}, {transform_indices = @transform_4, window_bounds = array<i64: 1, 16, 64>}]} {
    %c0 = arith.constant 0 : index
    %c0_0 = arith.constant 0 : index
    %c0_1 = arith.constant 0 : index
    %0 = vector.load %arg2[%c0, %c0_0, %c0_1] : memref<1x16x32xf32, #tpu.memory_space<vmem>>, vector<1x16x32xf32>
    %1 = vector.shape_cast %0 : vector<1x16x32xf32> to vector<16x32xf32>
    %2 = arith.truncf %1 : vector<16x32xf32> to vector<16x32xbf16>
    %c0_2 = arith.constant 0 : index
    %c0_3 = arith.constant 0 : index
    %c0_4 = arith.constant 0 : index
    %3 = vector.load %arg3[%c0_2, %c0_3, %c0_4] : memref<1x32x64xbf16, #tpu.memory_space<vmem>>, vector<1x32x64xbf16>
    %4 = vector.shape_cast %3 : vector<1x32x64xbf16> to vector<32x64xbf16>
    %cst = arith.constant dense<0.000000e+00> : vector<16x64xf32>
    %5 = tpu.matmul %2, %4, %cst {dimension_numbers = #tpu.dot_dimension_numbers<[1], [0], [0], [1], [0, 0, 1, 1], [], []>} : vector<16x32xbf16>, vector<32x64xbf16>, vector<16x64xf32> -> vector<16x64xf32>
    %c0_5 = arith.constant 0 : index
    %c0_6 = arith.constant 0 : index
    %c0_7 = arith.constant 0 : index
    %6 = vector.load %arg4[%c0_5, %c0_6, %c0_7] : memref<1x1x64xf32, #tpu.memory_space<vmem>>, vector<1x1x64xf32>
    %7 = vector.shape_cast %6 : vector<1x1x64xf32> to vector<1x64xf32>
    %8 = vector.broadcast %7 : vector<1x64xf32> to vector<16x64xf32>
    %9 = arith.mulf %5, %8 : vector<16x64xf32>
    %c0_8 = arith.constant 0 : index
    %c0_9 = arith.constant 0 : index
    %c0_10 = arith.constant 0 : index
    %10 = vector.load %arg5[%c0_8, %c0_9, %c0_10] : memref<1x1x64xf32, #tpu.memory_space<vmem>>, vector<1x1x64xf32>
    %11 = vector.shape_cast %10 : vector<1x1x64xf32> to vector<1x64xf32>
    %12 = vector.broadcast %11 : vector<1x64xf32> to vector<16x64xf32>
    %13 = arith.addf %9, %12 : vector<16x64xf32>
    %c0_11 = arith.constant 0 : index
    %c0_12 = arith.constant 0 : index
    %c0_13 = arith.constant 0 : index
    %14 = vector.load %arg6[%c0_11, %c0_12, %c0_13] : memref<1x16x64xf32, #tpu.memory_space<vmem>>, vector<1x16x64xf32>
    %15 = vector.shape_cast %14 : vector<1x16x64xf32> to vector<16x64xf32>
    %16 = vector.shape_cast %13 : vector<16x64xf32> to vector<1x16x64xf32>
    tpu.vector_store %arg6[%c0_11, %c0_12, %c0_13], %16 {strides = array<i32>} : memref<1x16x64xf32, #tpu.memory_space<vmem>>, vector<1x16x64xf32>,
    return
  }
  func.func @transform_0(%arg0: i32, %arg1: i32) -> (i32, i32, i32) {
    %c0_i32 = arith.constant 0 : i32
    %c0_i32_0 = arith.constant 0 : i32
    %c0_i32_1 = arith.constant 0 : i32
    return %c0_i32, %arg1, %c0_i32_0 : i32, i32, i32
  }
  func.func @transform_1(%arg0: i32, %arg1: i32) -> (i32, i32, i32) {
    %c0_i32 = arith.constant 0 : i32
    %c0_i32_0 = arith.constant 0 : i32
    %c0_i32_1 = arith.constant 0 : i32
    return %arg0, %c0_i32, %c0_i32_0 : i32, i32, i32
  }
  func.func @transform_2(%arg0: i32, %arg1: i32) -> (i32, i32, i32) {
    %c0_i32 = arith.constant 0 : i32
    %c0_i32_0 = arith.constant 0 : i32
    %c0_i32_1 = arith.constant 0 : i32
    return %arg0, %c0_i32, %c0_i32_0 : i32, i32, i32
  }
  func.func @transform_3(%arg0: i32, %arg1: i32) -> (i32, i32, i32) {
    %c0_i32 = arith.constant 0 : i32
    %c0_i32_0 = arith.constant 0 : i32
    %c0_i32_1 = arith.constant 0 : i32
    return %arg0, %c0_i32, %c0_i32_0 : i32, i32, i32
  }
  func.func @transform_4(%arg0: i32, %arg1: i32) -> (i32, i32, i32) {
    %c0_i32 = arith.constant 0 : i32
    %c0_i32_0 = arith.constant 0 : i32
    return %arg0, %arg1, %c0_i32 : i32, i32, i32
  }
}

module attributes {stable_mosaic.version = 11 : i64} {
  func.func @fused_linear_kernel(%arg0: i32, %arg1: i32, %arg2: memref<1x16x32xf32, #tpu.memory_space<vmem>>, %arg3: memref<1x16x16xf32, #tpu.memory_space<vmem>>, %arg4: memref<1x16x16xf32, #tpu.memory_space<vmem>>, %arg5: memref<1x32x32xbf16, #tpu.memory_space<vmem>>, %arg6: memref<1x16x32xbf16, #tpu.memory_space<vmem>>, %arg7: memref<1x16x32xbf16, #tpu.memory_space<vmem>>, %arg8: memref<1x1x32xf32, #tpu.memory_space<vmem>>, %arg9: memref<1x1x32xf32, #tpu.memory_space<vmem>>, %arg10: memref<1x16x32xf32, #tpu.memory_space<vmem>>) attributes {dimension_semantics = [#tpu.dimension_semantics<parallel>, #tpu.dimension_semantics<parallel>], iteration_bounds = array<i64: 1, 1>, scalar_prefetch = 0 : i64, scratch_operands = 0 : i64, tpu.core_type = #tpu.core_type<tc>, window_params = [{transform_indices = @transform_0, window_bounds = array<i64: 1, 16, 32>}, {transform_indices = @transform_1, window_bounds = array<i64: 1, 16, 16>}, {transform_indices = @transform_2, window_bounds = array<i64: 1, 16, 16>}, {transform_indices = @transform_3, window_bounds = array<i64: 1, 32, 32>}, {transform_indices = @transform_4, window_bounds = array<i64: 1, 16, 32>}, {transform_indices = @transform_5, window_bounds = array<i64: 1, 16, 32>}, {transform_indices = @transform_6, window_bounds = array<i64: 1, 1, 32>}, {transform_indices = @transform_7, window_bounds = array<i64: 1, 1, 32>}, {transform_indices = @transform_8, window_bounds = array<i64: 1, 16, 32>}]} {
    %c0 = arith.constant 0 : index
    %c0_0 = arith.constant 0 : index
    %c0_1 = arith.constant 0 : index
    %0 = vector.load %arg2[%c0, %c0_0, %c0_1] : memref<1x16x32xf32, #tpu.memory_space<vmem>>, vector<1x16x32xf32>
    %1 = vector.shape_cast %0 : vector<1x16x32xf32> to vector<16x32xf32>
    %2 = arith.truncf %1 : vector<16x32xf32> to vector<16x32xbf16>
    %c0_2 = arith.constant 0 : index
    %c0_3 = arith.constant 0 : index
    %c0_4 = arith.constant 0 : index
    %3 = vector.load %arg5[%c0_2, %c0_3, %c0_4] : memref<1x32x32xbf16, #tpu.memory_space<vmem>>, vector<1x32x32xbf16>
    %4 = vector.shape_cast %3 : vector<1x32x32xbf16> to vector<32x32xbf16>
    %cst = arith.constant dense<0.000000e+00> : vector<16x32xf32>
    %5 = tpu.matmul %2, %4, %cst {dimension_numbers = #tpu.dot_dimension_numbers<[1], [0], [0], [1], [0, 0, 1, 1], [], []>} : vector<16x32xbf16>, vector<32x32xbf16>, vector<16x32xf32> -> vector<16x32xf32>
    %c0_5 = arith.constant 0 : index
    %c0_6 = arith.constant 0 : index
    %c0_7 = arith.constant 0 : index
    %6 = vector.load %arg3[%c0_5, %c0_6, %c0_7] : memref<1x16x16xf32, #tpu.memory_space<vmem>>, vector<1x16x16xf32>
    %7 = vector.shape_cast %6 : vector<1x16x16xf32> to vector<16x16xf32>
    %8 = arith.truncf %7 : vector<16x16xf32> to vector<16x16xbf16>
    %c0_8 = arith.constant 0 : index
    %c0_9 = arith.constant 0 : index
    %c0_10 = arith.constant 0 : index
    %9 = vector.load %arg6[%c0_8, %c0_9, %c0_10] : memref<1x16x32xbf16, #tpu.memory_space<vmem>>, vector<1x16x32xbf16>
    %10 = vector.shape_cast %9 : vector<1x16x32xbf16> to vector<16x32xbf16>
    %cst_11 = arith.constant dense<0.000000e+00> : vector<16x32xf32>
    %11 = tpu.matmul %8, %10, %cst_11 {dimension_numbers = #tpu.dot_dimension_numbers<[1], [0], [0], [1], [0, 0, 1, 1], [], []>} : vector<16x16xbf16>, vector<16x32xbf16>, vector<16x32xf32> -> vector<16x32xf32>
    %12 = arith.addf %5, %11 : vector<16x32xf32>
    %c0_12 = arith.constant 0 : index
    %c0_13 = arith.constant 0 : index
    %c0_14 = arith.constant 0 : index
    %13 = vector.load %arg4[%c0_12, %c0_13, %c0_14] : memref<1x16x16xf32, #tpu.memory_space<vmem>>, vector<1x16x16xf32>
    %14 = vector.shape_cast %13 : vector<1x16x16xf32> to vector<16x16xf32>
    %15 = arith.truncf %14 : vector<16x16xf32> to vector<16x16xbf16>
    %c0_15 = arith.constant 0 : index
    %c0_16 = arith.constant 0 : index
    %c0_17 = arith.constant 0 : index
    %16 = vector.load %arg7[%c0_15, %c0_16, %c0_17] : memref<1x16x32xbf16, #tpu.memory_space<vmem>>, vector<1x16x32xbf16>
    %17 = vector.shape_cast %16 : vector<1x16x32xbf16> to vector<16x32xbf16>
    %cst_18 = arith.constant dense<0.000000e+00> : vector<16x32xf32>
    %18 = tpu.matmul %15, %17, %cst_18 {dimension_numbers = #tpu.dot_dimension_numbers<[1], [0], [0], [1], [0, 0, 1, 1], [], []>} : vector<16x16xbf16>, vector<16x32xbf16>, vector<16x32xf32> -> vector<16x32xf32>
    %19 = arith.addf %12, %18 : vector<16x32xf32>
    %c0_19 = arith.constant 0 : index
    %c0_20 = arith.constant 0 : index
    %c0_21 = arith.constant 0 : index
    %20 = vector.load %arg8[%c0_19, %c0_20, %c0_21] : memref<1x1x32xf32, #tpu.memory_space<vmem>>, vector<1x1x32xf32>
    %21 = vector.shape_cast %20 : vector<1x1x32xf32> to vector<1x32xf32>
    %22 = vector.broadcast %21 : vector<1x32xf32> to vector<16x32xf32>
    %23 = arith.mulf %19, %22 : vector<16x32xf32>
    %c0_22 = arith.constant 0 : index
    %c0_23 = arith.constant 0 : index
    %c0_24 = arith.constant 0 : index
    %24 = vector.load %arg9[%c0_22, %c0_23, %c0_24] : memref<1x1x32xf32, #tpu.memory_space<vmem>>, vector<1x1x32xf32>
    %25 = vector.shape_cast %24 : vector<1x1x32xf32> to vector<1x32xf32>
    %26 = vector.broadcast %25 : vector<1x32xf32> to vector<16x32xf32>
    %27 = arith.addf %23, %26 : vector<16x32xf32>
    %cst_25 = arith.constant 0.000000e+00 : f32
    %28 = vector.broadcast %cst_25 : f32 to vector<16x32xf32>
    %29 = arith.maximumf %27, %28 : vector<16x32xf32>
    %c0_26 = arith.constant 0 : index
    %c0_27 = arith.constant 0 : index
    %c0_28 = arith.constant 0 : index
    %30 = vector.load %arg10[%c0_26, %c0_27, %c0_28] : memref<1x16x32xf32, #tpu.memory_space<vmem>>, vector<1x16x32xf32>
    %31 = vector.shape_cast %30 : vector<1x16x32xf32> to vector<16x32xf32>
    %32 = vector.shape_cast %29 : vector<16x32xf32> to vector<1x16x32xf32>
    tpu.vector_store %arg10[%c0_26, %c0_27, %c0_28], %32 {strides = array<i32>} : memref<1x16x32xf32, #tpu.memory_space<vmem>>, vector<1x16x32xf32>,
    return
  }
  func.func @transform_0(%arg0: i32, %arg1: i32) -> (i32, i32, i32) {
    %c0_i32 = arith.constant 0 : i32
    %c0_i32_0 = arith.constant 0 : i32
    %c0_i32_1 = arith.constant 0 : i32
    return %c0_i32, %arg1, %c0_i32_0 : i32, i32, i32
  }
  func.func @transform_1(%arg0: i32, %arg1: i32) -> (i32, i32, i32) {
    %c0_i32 = arith.constant 0 : i32
    %c0_i32_0 = arith.constant 0 : i32
    %c0_i32_1 = arith.constant 0 : i32
    return %c0_i32, %arg1, %c0_i32_0 : i32, i32, i32
  }
  func.func @transform_2(%arg0: i32, %arg1: i32) -> (i32, i32, i32) {
    %c1_i32 = arith.constant 1 : i32
    %c0_i32 = arith.constant 0 : i32
    %c0_i32_0 = arith.constant 0 : i32
    return %c1_i32, %arg1, %c0_i32 : i32, i32, i32
  }
  func.func @transform_3(%arg0: i32, %arg1: i32) -> (i32, i32, i32) {
    %c0_i32 = arith.constant 0 : i32
    %c0_i32_0 = arith.constant 0 : i32
    %c0_i32_1 = arith.constant 0 : i32
    return %arg0, %c0_i32, %c0_i32_0 : i32, i32, i32
  }
  func.func @transform_4(%arg0: i32, %arg1: i32) -> (i32, i32, i32) {
    %c0_i32 = arith.constant 0 : i32
    %c0_i32_0 = arith.constant 0 : i32
    %c0_i32_1 = arith.constant 0 : i32
    return %arg0, %c0_i32, %c0_i32_0 : i32, i32, i32
  }
  func.func @transform_5(%arg0: i32, %arg1: i32) -> (i32, i32, i32) {
    %c0_i32 = arith.constant 0 : i32
    %c0_i32_0 = arith.constant 0 : i32
    %c0_i32_1 = arith.constant 0 : i32
    return %arg0, %c0_i32, %c0_i32_0 : i32, i32, i32
  }
  func.func @transform_6(%arg0: i32, %arg1: i32) -> (i32, i32, i32) {
    %c0_i32 = arith.constant 0 : i32
    %c0_i32_0 = arith.constant 0 : i32
    %c0_i32_1 = arith.constant 0 : i32
    return %arg0, %c0_i32, %c0_i32_0 : i32, i32, i32
  }
  func.func @transform_7(%arg0: i32, %arg1: i32) -> (i32, i32, i32) {
    %c0_i32 = arith.constant 0 : i32
    %c0_i32_0 = arith.constant 0 : i32
    %c0_i32_1 = arith.constant 0 : i32
    return %arg0, %c0_i32, %c0_i32_0 : i32, i32, i32
  }
  func.func @transform_8(%arg0: i32, %arg1: i32) -> (i32, i32, i32) {
    %c0_i32 = arith.constant 0 : i32
    %c0_i32_0 = arith.constant 0 : i32
    return %arg0, %arg1, %c0_i32 : i32, i32, i32
  }
}

module attributes {stable_mosaic.version = 11 : i64} {
  func.func @fused_linear_kernel(%arg0: i32, %arg1: i32, %arg2: memref<1x16x32xf32, #tpu.memory_space<vmem>>, %arg3: memref<1x32x48xbf16, #tpu.memory_space<vmem>>, %arg4: memref<1x1x48xf32, #tpu.memory_space<vmem>>, %arg5: memref<1x1x48xf32, #tpu.memory_space<vmem>>, %arg6: memref<1x16x48xf32, #tpu.memory_space<vmem>>) attributes {dimension_semantics = [#tpu.dimension_semantics<parallel>, #tpu.dimension_semantics<parallel>], iteration_bounds = array<i64: 1, 1>, scalar_prefetch = 0 : i64, scratch_operands = 0 : i64, tpu.core_type = #tpu.core_type<tc>, window_params = [{transform_indices = @transform_0, window_bounds = array<i64: 1, 16, 32>}, {transform_indices = @transform_1, window_bounds = array<i64: 1, 32, 48>}, {transform_indices = @transform_2, window_bounds = array<i64: 1, 1, 48>}, {transform_indices = @transform_3, window_bounds = array<i64: 1, 1, 48>}, {transform_indices = @transform_4, window_bounds = array<i64: 1, 16, 48>}]} {
    %c0 = arith.constant 0 : index
    %c0_0 = arith.constant 0 : index
    %c0_1 = arith.constant 0 : index
    %0 = vector.load %arg2[%c0, %c0_0, %c0_1] : memref<1x16x32xf32, #tpu.memory_space<vmem>>, vector<1x16x32xf32>
    %1 = vector.shape_cast %0 : vector<1x16x32xf32> to vector<16x32xf32>
    %2 = arith.truncf %1 : vector<16x32xf32> to vector<16x32xbf16>
    %c0_2 = arith.constant 0 : index
    %c0_3 = arith.constant 0 : index
    %c0_4 = arith.constant 0 : index
    %3 = vector.load %arg3[%c0_2, %c0_3, %c0_4] : memref<1x32x48xbf16, #tpu.memory_space<vmem>>, vector<1x32x48xbf16>
    %4 = vector.shape_cast %3 : vector<1x32x48xbf16> to vector<32x48xbf16>
    %cst = arith.constant dense<0.000000e+00> : vector<16x48xf32>
    %5 = tpu.matmul %2, %4, %cst {dimension_numbers = #tpu.dot_dimension_numbers<[1], [0], [0], [1], [0, 0, 1, 1], [], []>} : vector<16x32xbf16>, vector<32x48xbf16>, vector<16x48xf32> -> vector<16x48xf32>
    %c0_5 = arith.constant 0 : index
    %c0_6 = arith.constant 0 : index
    %c0_7 = arith.constant 0 : index
    %6 = vector.load %arg4[%c0_5, %c0_6, %c0_7] : memref<1x1x48xf32, #tpu.memory_space<vmem>>, vector<1x1x48xf32>
    %7 = vector.shape_cast %6 : vector<1x1x48xf32> to vector<1x48xf32>
    %8 = vector.broadcast %7 : vector<1x48xf32> to vector<16x48xf32>
    %9 = arith.mulf %5, %8 : vector<16x48xf32>
    %c0_8 = arith.constant 0 : index
    %c0_9 = arith.constant 0 : index
    %c0_10 = arith.constant 0 : index
    %10 = vector.load %arg5[%c0_8, %c0_9, %c0_10] : memref<1x1x48xf32, #tpu.memory_space<vmem>>, vector<1x1x48xf32>
    %11 = vector.shape_cast %10 : vector<1x1x48xf32> to vector<1x48xf32>
    %12 = vector.broadcast %11 : vector<1x48xf32> to vector<16x48xf32>
    %13 = arith.addf %9, %12 : vector<16x48xf32>
    %cst_11 = arith.constant 0.000000e+00 : f32
    %14 = vector.broadcast %cst_11 : f32 to vector<16x48xf32>
    %15 = arith.maximumf %13, %14 : vector<16x48xf32>
    %c0_12 = arith.constant 0 : index
    %c0_13 = arith.constant 0 : index
    %c0_14 = arith.constant 0 : index
    %16 = vector.load %arg6[%c0_12, %c0_13, %c0_14] : memref<1x16x48xf32, #tpu.memory_space<vmem>>, vector<1x16x48xf32>
    %17 = vector.shape_cast %16 : vector<1x16x48xf32> to vector<16x48xf32>
    %18 = vector.shape_cast %15 : vector<16x48xf32> to vector<1x16x48xf32>
    tpu.vector_store %arg6[%c0_12, %c0_13, %c0_14], %18 {strides = array<i32>} : memref<1x16x48xf32, #tpu.memory_space<vmem>>, vector<1x16x48xf32>,
    return
  }
  func.func @transform_0(%arg0: i32, %arg1: i32) -> (i32, i32, i32) {
    %c0_i32 = arith.constant 0 : i32
    %c0_i32_0 = arith.constant 0 : i32
    %c0_i32_1 = arith.constant 0 : i32
    return %c0_i32, %arg1, %c0_i32_0 : i32, i32, i32
  }
  func.func @transform_1(%arg0: i32, %arg1: i32) -> (i32, i32, i32) {
    %c0_i32 = arith.constant 0 : i32
    %c0_i32_0 = arith.constant 0 : i32
    %c0_i32_1 = arith.constant 0 : i32
    return %arg0, %c0_i32, %c0_i32_0 : i32, i32, i32
  }
  func.func @transform_2(%arg0: i32, %arg1: i32) -> (i32, i32, i32) {
    %c0_i32 = arith.constant 0 : i32
    %c0_i32_0 = arith.constant 0 : i32
    %c0_i32_1 = arith.constant 0 : i32
    return %arg0, %c0_i32, %c0_i32_0 : i32, i32, i32
  }
  func.func @transform_3(%arg0: i32, %arg1: i32) -> (i32, i32, i32) {
    %c0_i32 = arith.constant 0 : i32
    %c0_i32_0 = arith.constant 0 : i32
    %c0_i32_1 = arith.constant 0 : i32
    return %arg0, %c0_i32, %c0_i32_0 : i32, i32, i32
  }
  func.func @transform_4(%arg0: i32, %arg1: i32) -> (i32, i32, i32) {
    %c0_i32 = arith.constant 0 : i32
    %c0_i32_0 = arith.constant 0 : i32
    return %arg0, %arg1, %c0_i32 : i32, i32, i32
  }
}

module attributes {stable_mosaic.version = 11 : i64} {
  func.func @mask_mul_kernel(%arg0: i32, %arg1: memref<1x24x8xf32, #tpu.memory_space<vmem>>, %arg2: memref<1x24x8xf32, #tpu.memory_space<vmem>>, %arg3: memref<1x24x8xf32, #tpu.memory_space<vmem>>) attributes {dimension_semantics = [#tpu.dimension_semantics<parallel>], iteration_bounds = array<i64: 4>, scalar_prefetch = 0 : i64, scratch_operands = 0 : i64, tpu.core_type = #tpu.core_type<tc>, window_params = [{transform_indices = @transform_0, window_bounds = array<i64: 1, 24, 8>}, {transform_indices = @transform_1, window_bounds = array<i64: 1, 24, 8>}, {transform_indices = @transform_2, window_bounds = array<i64: 1, 24, 8>}]} {
    %c0 = arith.constant 0 : index
    %c0_0 = arith.constant 0 : index
    %c0_1 = arith.constant 0 : index
    %0 = vector.load %arg1[%c0, %c0_0, %c0_1] : memref<1x24x8xf32, #tpu.memory_space<vmem>>, vector<1x24x8xf32>
    %1 = vector.shape_cast %0 : vector<1x24x8xf32> to vector<24x8xf32>
    %c0_2 = arith.constant 0 : index
    %c0_3 = arith.constant 0 : index
    %c0_4 = arith.constant 0 : index
    %2 = vector.load %arg2[%c0_2, %c0_3, %c0_4] : memref<1x24x8xf32, #tpu.memory_space<vmem>>, vector<1x24x8xf32>
    %3 = vector.shape_cast %2 : vector<1x24x8xf32> to vector<24x8xf32>
    %4 = arith.mulf %1, %3 : vector<24x8xf32>
    %c0_5 = arith.constant 0 : index
    %c0_6 = arith.constant 0 : index
    %c0_7 = arith.constant 0 : index
    %5 = vector.load %arg3[%c0_5, %c0_6, %c0_7] : memref<1x24x8xf32, #tpu.memory_space<vmem>>, vector<1x24x8xf32>
    %6 = vector.shape_cast %5 : vector<1x24x8xf32> to vector<24x8xf32>
    %7 = vector.shape_cast %4 : vector<24x8xf32> to vector<1x24x8xf32>
    tpu.vector_store %arg3[%c0_5, %c0_6, %c0_7], %7 {strides = array<i32>} : memref<1x24x8xf32, #tpu.memory_space<vmem>>, vector<1x24x8xf32>,
    return
  }
  func.func @transform_0(%arg0: i32) -> (i32, i32, i32) {
    %c0_i32 = arith.constant 0 : i32
    %c0_i32_0 = arith.constant 0 : i32
    %c0_i32_1 = arith.constant 0 : i32
    return %arg0, %c0_i32, %c0_i32_0 : i32, i32, i32
  }
  func.func @transform_1(%arg0: i32) -> (i32, i32, i32) {
    %c0_i32 = arith.constant 0 : i32
    %c0_i32_0 = arith.constant 0 : i32
    %c0_i32_1 = arith.constant 0 : i32
    return %arg0, %c0_i32, %c0_i32_0 : i32, i32, i32
  }
  func.func @transform_2(%arg0: i32) -> (i32, i32, i32) {
    %c0_i32 = arith.constant 0 : i32
    %c0_i32_0 = arith.constant 0 : i32
    %c0_i32_1 = arith.constant 0 : i32
    return %arg0, %c0_i32, %c0_i32_0 : i32, i32, i32
  }
}

</mosaic_0001>

<bundles_post_ra>
// kernel: tile.39
= control target key start
LH: loop header
LB: loop body
LE: loop exit
PB: predicated region body
PF: predicated region fallthrough
CT: control target
= control target key end

     0   :  { %vm8_vm0 = vcmask 195584   ;;  %vm14_vm1 = vcmask 392384   ;;  %s42_s0 = inlined_call_operand.vmem [shape: f32[2,24], index: 0, kind: input, shape index: {}]   ;;  %s43_s1 = inlined_call_operand.vmem [shape: f32[48], index: 1, kind: output, shape index: {}]  }
   0x1   :  { %v5_v0 = vld [vmem:[%s42_s0] sm:$0x3]  ;;  %s25_s0 = smov 24  }
   0x2   :  { %6 = vst [vmem:[#allocation1] sm:$0x3] %v5_v0 }
   0x9   :  { %v11_v1 = vld [vmem:[#allocation1 + $0x1] sm:$0x1]   ;;  %v7_v2 = vld [vmem:[#allocation1] sm:$0x1]  }
   0xa   :  { %12 = vrot.lane.b32.xlu0 %v11_v1, %s25_s0  ;;  %9 = vst.msk [vmem:[#allocation0] sm:$0x1] %vm8_vm0, %v7_v2  }
  0x7c   :  { %v13_v3 = vpop.permute.xlu0 %12  }
  0x7d   :  { %15 = vst.msk [vmem:[#allocation0] sm:$0x1] %vm14_vm1, %v13_v3  }
  0x84   :  { %v20_v4 = vld [vmem:[#allocation0] sm:$0x1] }
  0x85   :  { %23 = vst [vmem:[%s43_s1] sm:$0x1] %v20_v4 }

// kernel: tile.33
= control target key start
LH: loop header
LB: loop body
LE: loop exit
PB: predicated region body
PF: predicated region fallthrough
CT: control target
= control target key end

     0   :  { %s22_s0 = inlined_call_operand.vmem [shape: f32[24], index: 0, kind: input, shape index: {}]   ;;  %s23_s1 = inlined_call_operand.vmem [shape: f32[2,24], index: 1, kind: output, shape index: {}]  }
   0x1   :  { %v4_v0 = vld [vmem:[%s22_s0] ss:$0 sm:$0xff] }
   0x2   :  { %5 = vst [vmem:[%s23_s1] sm:$0x3] %v4_v0 }

// kernel: tile.38
= control target key start
LH: loop header
LB: loop body
LE: loop exit
PB: predicated region body
PF: predicated region fallthrough
CT: control target
= control target key end

     0   :  { %2 = vsyncpa [#allocation1], 0  ;;  %s42_s6 = smov [#allocation0]   ;;  %s59_s0 = inlined_call_operand.hbm [shape: f32[24], index: 0, kind: input, shape index: {}]   ;;  %s60_s1 = inlined_call_operand.vmem [shape: f32[2,24], index: 1, kind: output, shape index: {}]  }
   0x1   :  { %s9_s7 = sshll.u32 %s42_s6, 4  ;;  %s10_s7 = int_to_ptr.vmem [resolvable:$true] %s9_s7 }
   0x2   :  { %s28_s8 = scalar_lea.vmem %s10_s7, 16  ;;  %s32_s9 = scalar_lea.vmem %s10_s7, 32 }
   0x3   :  { %p29_p0 = scmp.ne.s32.totalorder %s10_s7, %s28_s8  ;;  %p33_p1 = scmp.lt.s32.totalorder %s10_s7, %s10_s7 }
   0x4   :  { %p34_p2 = scmp.lt.s32.totalorder %s32_s9, %s28_s8 }
   0x6   :  { %p35_p3 = por %p34_p2, %p33_p1 }
   0x8   :  { %p36_p4 = pnand %p35_p3, %p29_p0 }
   0xa   :  { %39 = shalt.err (!%p36_p4)
}
   0xb   :  { %12 = dma.hbm_to_vmem [thread:$0]  %s59_s0, 16, %s10_s7, [#allocation1]  }
   0xc   :  { %40 = dma.done.wait [#allocation1], 16  }
   0xd   :  { %41 = vsyncadd [#allocation1], 4294967280  ;;  %v16_v0 = vld [vmem:[#allocation0] ss:$0 sm:$0xff] }
   0xe   :  { %17 = vst [vmem:[%s60_s1] sm:$0x3] %v16_v0 }
   0xf   :  { %18 = vsyncpa [#allocation1], 1 }

// kernel: tile.28
= control target key start
LH: loop header
LB: loop body
LE: loop exit
PB: predicated region body
PF: predicated region fallthrough
CT: control target
= control target key end

     0   :  { %vm8_vm0 = vcmask 130048   ;;  %vm14_vm1 = vcmask 261248   ;;  %s42_s0 = inlined_call_operand.vmem [shape: f32[2,16], index: 0, kind: input, shape index: {}]   ;;  %s43_s1 = inlined_call_operand.vmem [shape: f32[32], index: 1, kind: output, shape index: {}]  }
   0x1   :  { %v5_v0 = vld [vmem:[%s42_s0] sm:$0x3]  ;;  %s25_s0 = smov 16  }
   0x2   :  { %6 = vst [vmem:[#allocation1] sm:$0x3] %v5_v0 }
   0x9   :  { %v11_v1 = vld [vmem:[#allocation1 + $0x1] sm:$0x1]   ;;  %v7_v2 = vld [vmem:[#allocation1] sm:$0x1]  }
   0xa   :  { %12 = vrot.lane.b32.xlu0 %v11_v1, %s25_s0  ;;  %9 = vst.msk [vmem:[#allocation0] sm:$0x1] %vm8_vm0, %v7_v2  }
  0x7c   :  { %v13_v3 = vpop.permute.xlu0 %12  }
  0x7d   :  { %15 = vst.msk [vmem:[#allocation0] sm:$0x1] %vm14_vm1, %v13_v3  }
  0x84   :  { %v20_v4 = vld [vmem:[#allocation0] sm:$0x1] }
  0x85   :  { %23 = vst [vmem:[%s43_s1] sm:$0x1] %v20_v4 }

// kernel: tile.27
= control target key start
LH: loop header
LB: loop body
LE: loop exit
PB: predicated region body
PF: predicated region fallthrough
CT: control target
= control target key end

     0   :  { %s22_s0 = inlined_call_operand.vmem [shape: f32[16], index: 0, kind: input, shape index: {}]   ;;  %s23_s1 = inlined_call_operand.vmem [shape: f32[2,16], index: 1, kind: output, shape index: {}]  }
   0x1   :  { %v4_v0 = vld [vmem:[%s22_s0] ss:$0 sm:$0xff] }
   0x2   :  { %5 = vst [vmem:[%s23_s1] sm:$0x3] %v4_v0 }

// kernel: openunmix_forward_pallas.8
= control target key start
LH: loop header
LB: loop body
LE: loop exit
PB: predicated region body
PF: predicated region fallthrough
CT: control target
= control target key end

     0   :  { %v132_v0 = vmov 0.0   ;;  %vm133_vm0 = vmmov 0   ;;  %vm37_vm1 = vcmask 261120   ;;  %s186_s1 = inlined_call_operand.vmem [shape: bf16[1,32,32], index: 1, kind: input, shape index: {}]   ;;  %s187_s0 = inlined_call_operand.vmem [shape: f32[16,32], index: 0, kind: input, shape index: {}]   ;;  %s188_s2 = inlined_call_operand.vmem [shape: f32[1,1,32], index: 2, kind: input, shape index: {}]   ;;  %s189_s3 = inlined_call_operand.vmem [shape: f32[1,1,32], index: 3, kind: input, shape index: {}]   ;;  %s190_s4 = inlined_call_operand.vmem [shape: f32[1,16,32], index: 4, kind: output, shape index: {}]  }
   0x1   :  { %116 = vmatprep.subr.bf16.mxu0 %v132_v0  ;;  %v126_v1 = vld [vmem:[%s186_s1 + $0x8] sm:$0xff]   ;;  %120 = vmatprep.mubr.msk.bf16.mxu0 %vm133_vm0, %v132_v0  ;;  %v127_v2 = vld [vmem:[%s186_s1] sm:$0xff]  }
   0x2   :  { %117 = vmatpush3.bf16.msra.mxu0 %v126_v1  ;;  %v18_v3 = vld [vmem:[%s187_s0] sm:$0xff]  ;;  %v19_v4 = vld [vmem:[%s187_s0 + $0x8] sm:$0xff] }
   0x3   :  { %118 = vmatprep.subr.bf16.mxu0 %v132_v0  ;;  %v20_v5 = vpack.c.bf16 %v19_v4, %v18_v3  ;;  %v111_v6 = vld [vmem:[%s188_s2] ss:$0 sm:$0xff] }
   0x4   :  { %v112_v8 = vld [vmem:[%s189_s3] ss:$0 sm:$0xff] }
   0x6   :  { %119 = vmatpush3.bf16.msra.mxu0 %v127_v2 }
   0x9   :  { %121 = vmatmul.mubr.msk.bf16.vlgmr.msra.gmra.mxu0 %vm37_vm1, %v20_v5 }
  0xc9   :  { %v75_v7 = vpop.f32.mrf.mxu0 }
  0xca   :  { %v89_v9 = vmul.f32 %v111_v6, %v75_v7 }
  0xcb   :  { %v122_v10 = vpop.f32.mrf.mxu0 }
  0xcc   :  { %v98_v11 = vadd.f32 %v112_v8, %v89_v9 }
  0xcd   :  { %v78_v12 = vpop.f32.mrf.mxu0 }
  0xce   :  { %128 = vtanh.f32 %v98_v11  ;;  %v90_v13 = vmul.f32 %v111_v6, %v78_v12 }
  0xcf   :  { %v123_v14 = vpop.f32.mrf.mxu0 }
  0xd0   :  { %v99_v15 = vadd.f32 %v112_v8, %v90_v13 }
  0xd2   :  { %130 = vtanh.f32 %v99_v15 }
  0xdb   :  { %v129_v16 = vpop.eup %128 }
  0xdc   :  { %102 = vst.msk [vmem:[%s190_s4] sm:$0xff] %vm37_vm1, %v129_v16 }
  0xdf   :  { %v131_v17 = vpop.eup %130 }
  0xe0   :  { %103 = vst.msk [vmem:[%s190_s4 + $0x8] sm:$0xff] %vm37_vm1, %v131_v17 }

// kernel: openunmix_forward_pallas.11
= control target key start
LH: loop header
LB: loop body
LE: loop exit
PB: predicated region body
PF: predicated region fallthrough
CT: control target
= control target key end

     0   :  { %s778_s21 = smov 0   ;;  %s780_s22 = smov 0   ;;  %s838_s0 = inlined_call_operand.vmem [shape: f32[2,16,16], index: 0, kind: input, shape index: {}, may-alias: {0,1}]   ;;  %s839_s1 = inlined_call_operand.vmem [shape: f32[2,16,16], index: 1, kind: input, shape index: {}, may-alias: {0,1}]   ;;  %s840_s2 = inlined_call_operand.vmem [shape: bf16[2,16,64], index: 2, kind: input, shape index: {}]   ;;  %s841_s3 = inlined_call_operand.vmem [shape: bf16[2,16,64], index: 3, kind: input, shape index: {}]   ;;  %s842_s4 = inlined_call_operand.vmem [shape: f32[2,1,64], index: 4, kind: input, shape index: {}]   ;;  %s843_s5 = inlined_call_operand.vmem [shape: f32[2,1,64], index: 5, kind: input, shape index: {}]   ;;  %s844_s6 = inlined_call_operand.vmem [shape: f32[2,16,64], index: 6, kind: output, shape index: {}]  }
   0x1   :  { %s782_s23 = smov 0  }
   0x2 LB: > { %s28_s24 = sadd.s32 1, %s735_s22  ;;  %p653_p0 = scmp.ge.s32.totalorder %s739_s23, 1  ;;  %s739_s23 = sphi %s782_s23, %s16_s23   ;;  %s735_s22 = sphi %s780_s22, %s846_s22   ;;  %s731_s21 = sphi %s778_s21, %s845_s21  }
   0x3   : > { %p30_p1 = scmp.ge.s32.totalorder %s28_s24, 2  ;;  %p275_p2 = scmp.lt.s32.totalorder %s739_s23, 3 }
   0x5   : > { %s848_s24 = smov (%p30_p1, %s28_s24), 0  ;;  %p276_p3 = pnand %p653_p0, %p275_p2 }
   0x6   : > { %p344_p4 = scmp.lt.s32.totalorder (!%p276_p3), %s731_s21, 1 }
   0x7   : > { %279 = sbr.rel (%p276_p3) target bundleno = 224 (0xe0), region = 44 }
   0xc   : > { %v741_v0 = vmov 0.0   ;;  %s850_s21 = smov (!%p344_p4, %s731_s21), 1  ;;  %vm742_vm0 = vmmov 0   ;;  %v660_v1 = vld [vmem:[%s839_s1 + $0x10] sm:$0xff]  ;;  %v661_v2 = vld [vmem:[%s839_s1 + $0x18] sm:$0xff]  ;;  %v371_v3 = vld [vmem:[%s838_s0] sm:$0xff] }
   0xd   : > { %677 = vmatprep.subr.bf16.mxu0 %v741_v0  ;;  %683 = vmatprep.subr.bf16.mxu1 %v741_v0  ;;  %s670_s25 = sshll.u32 %s850_s21, 3  ;;  %v372_v4 = vld [vmem:[%s838_s0 + $0x8] sm:$0xff]  ;;  %v378_v7 = vpack.c.bf16 %v661_v2, %v660_v1  ;;  %vm387_vm1 = vcmask 130048   ;;  %s356_s18 = scalar_lea.vmem %s842_s4, %s850_s21  ;;  %vm500_vm2 = vcmask 523264  }
   0xe   : > { %679 = vmatprep.mubr.msk.bf16.mxu0 %vm742_vm0, %v741_v0  ;;  %685 = vmatprep.mubr.msk.bf16.mxu1 %vm742_vm0, %v741_v0  ;;  %s353_s8 = scalar_lea.vmem %s841_s3, %s670_s25  ;;  %s348_s11 = scalar_lea.vmem %s840_s2, %s670_s25  ;;  %v373_v8 = vpack.c.bf16 %v372_v4, %v371_v3  ;;  %v666_v11 = vld [vmem:[%s356_s18] ss:$0 sm:$0xff] }
   0xf   : > { %v715_v5 = vld [vmem:[%s353_s8] sm:$0xff]   ;;  %s359_s25 = scalar_lea.vmem %s843_s5, %s850_s21  ;;  %s672_s26 = sshll.u32 %s850_s21, 4 }
  0x10   : > { %v716_v6 = vld [vmem:[%s348_s11] sm:$0xff]   ;;  %678 = vmatpush3.bf16.msra.mxu0 %v715_v5  ;;  %s368_s29 = scalar_lea.vmem %s844_s6, %s672_s26 }
  0x11   : > { %684 = vmatpush3.bf16.msra.mxu1 %v716_v6  ;;  %v667_v14 = vld [vmem:[%s359_s25] ss:$0 sm:$0xff] }
  0x13   : > { %680 = vmatmul.mubr.msk.bf16.vlgmr.msra.gmra.mxu0 %vm387_vm1, %v378_v7 }
  0x14   : > { %686 = vmatmul.mubr.msk.bf16.vlgmr.msra.gmra.mxu1 %vm387_vm1, %v373_v8 }
  0xd3   : > { %v425_v9 = vpop.f32.mrf.mxu0 }
  0xd4   : > { %v475_v10 = vpop.f32.mrf.mxu1 }
  0xd5   : > { %v476_v12 = vadd.f32 %v475_v10, %v425_v9  ;;  %v681_v13 = vpop.f32.mrf.mxu0 }
  0xd6   : > { %v687_v15 = vpop.f32.mrf.mxu1 }
  0xd7   : > { %v489_v16 = vmul.f32 %v666_v11, %v476_v12  ;;  %v428_v17 = vpop.f32.mrf.mxu0 }
  0xd8   : > { %v478_v18 = vpop.f32.mrf.mxu1 }
  0xd9   : > { %v498_v19 = vadd.f32 %v667_v14, %v489_v16  ;;  %v479_v20 = vadd.f32 %v478_v18, %v428_v17  ;;  %v682_v21 = vpop.f32.mrf.mxu0 }
  0xda   : > { %v688_v22 = vpop.f32.mrf.mxu1 }
  0xdb   : > { %501 = vst.msk [vmem:[%s368_s29] sm:$0xff] %vm500_vm2, %v498_v19  ;;  %v490_v23 = vmul.f32 %v666_v11, %v479_v20 }
  0xdd   : > { %v499_v24 = vadd.f32 %v667_v14, %v490_v23 }
  0xdf   : > { %502 = vst.msk [vmem:[%s368_s29 + $0x8] sm:$0xff] %vm500_vm2, %v499_v24 }
  0xe0 PF: > { %s16_s23 = sadd.s32 1, %s739_s23   ;;  %s845_s21 = smov %s735_s22 }
  0xe1   : > { %p13_p5 = scmp.ge.s32.totalorder %s16_s23, 4   ;;  %s846_s22 = smov %s848_s24 }
  0xe3   :  { %15 = sbr.rel (!%p13_p5) target bundleno = 2 (0x2), region = 89 }

// kernel: openunmix_forward_pallas.9
= control target key start
LH: loop header
LB: loop body
LE: loop exit
PB: predicated region body
PF: predicated region fallthrough
CT: control target
= control target key end

     0   :  { %s580_s15 = smov 0   ;;  %s582_s16 = smov 0   ;;  %s625_s0 = inlined_call_operand.vmem [shape: f32[1,16,32], index: 0, kind: input, shape index: {}]   ;;  %s626_s1 = inlined_call_operand.vmem [shape: bf16[2,32,64], index: 1, kind: input, shape index: {}]   ;;  %s627_s2 = inlined_call_operand.vmem [shape: f32[2,1,64], index: 2, kind: input, shape index: {}]   ;;  %s628_s3 = inlined_call_operand.vmem [shape: f32[2,1,64], index: 3, kind: input, shape index: {}]   ;;  %s629_s4 = inlined_call_operand.vmem [shape: f32[2,16,64], index: 4, kind: output, shape index: {}]  }
   0x1   :  { %s584_s17 = smov 0  }
   0x2 LB: > { %s26_s18 = sadd.s32 1, %s547_s16  ;;  %p476_p0 = scmp.ge.s32.totalorder %s551_s17, 1  ;;  %s551_s17 = sphi %s584_s17, %s14_s17   ;;  %s547_s16 = sphi %s582_s16, %s631_s16   ;;  %s543_s15 = sphi %s580_s15, %s630_s15  }
   0x3   : > { %p28_p1 = scmp.ge.s32.totalorder %s26_s18, 2  ;;  %p203_p2 = scmp.lt.s32.totalorder %s551_s17, 3 }
   0x5   : > { %s633_s18 = smov (%p28_p1, %s26_s18), 0  ;;  %p204_p3 = pnand %p476_p0, %p203_p2 }
   0x6   : > { %p250_p4 = scmp.lt.s32.totalorder (!%p204_p3), %s543_s15, 1 }
   0x7   : > { %207 = sbr.rel (%p204_p3) target bundleno = 225 (0xe1), region = 36 }
   0xc   : > { %v553_v0 = vmov 0.0   ;;  %vm554_vm0 = vmmov 0   ;;  %s635_s15 = smov (!%p250_p4, %s543_s15), 1  ;;  %v272_v3 = vld [vmem:[%s625_s0] sm:$0xff]  ;;  %v273_v4 = vld [vmem:[%s625_s0 + $0x8] sm:$0xff]  ;;  %vm291_vm1 = vcmask 261120  }
   0xd   : > { %493 = vmatprep.subr.bf16.mxu0 %v553_v0  ;;  %497 = vmatprep.mubr.msk.bf16.mxu0 %vm554_vm0, %v553_v0  ;;  %s488_s19 = sshll.u32 %s635_s15, 4  ;;  %v274_v5 = vpack.c.bf16 %v273_v4, %v272_v3  ;;  %s257_s29 = scalar_lea.vmem %s627_s2, %s635_s15  ;;  %vm354_vm2 = vcmask 523264  }
   0xe   : > { %s254_s22 = scalar_lea.vmem %s626_s1, %s488_s19  ;;  %s260_s6 = scalar_lea.vmem %s628_s3, %s635_s15  ;;  %v484_v6 = vld [vmem:[%s257_s29] ss:$0 sm:$0xff] }
   0xf   : > { %v527_v1 = vld [vmem:[%s254_s22 + $0x8] sm:$0xff]   ;;  %v528_v2 = vld [vmem:[%s254_s22] sm:$0xff]   ;;  %s269_s9 = scalar_lea.vmem %s629_s4, %s488_s19 }
  0x10   : > { %494 = vmatpush3.bf16.msra.mxu0 %v527_v1  ;;  %v485_v8 = vld [vmem:[%s260_s6] ss:$0 sm:$0xff] }
  0x11   : > { %495 = vmatprep.subr.bf16.mxu0 %v553_v0 }
  0x14   : > { %496 = vmatpush3.bf16.msra.mxu0 %v528_v2 }
  0x17   : > { %498 = vmatmul.mubr.msk.bf16.vlgmr.msra.gmra.mxu0 %vm291_vm1, %v274_v5 }
  0xd7   : > { %v329_v7 = vpop.f32.mrf.mxu0 }
  0xd8   : > { %v343_v9 = vmul.f32 %v484_v6, %v329_v7 }
  0xd9   : > { %v499_v10 = vpop.f32.mrf.mxu0 }
  0xda   : > { %v352_v11 = vadd.f32 %v485_v8, %v343_v9 }
  0xdb   : > { %v332_v12 = vpop.f32.mrf.mxu0 }
  0xdc   : > { %355 = vst.msk [vmem:[%s269_s9] sm:$0xff] %vm354_vm2, %v352_v11  ;;  %v344_v13 = vmul.f32 %v484_v6, %v332_v12 }
  0xdd   : > { %v500_v14 = vpop.f32.mrf.mxu0 }
  0xde   : > { %v353_v15 = vadd.f32 %v485_v8, %v344_v13 }
  0xe0   : > { %356 = vst.msk [vmem:[%s269_s9 + $0x8] sm:$0xff] %vm354_vm2, %v353_v15 }
  0xe1 PF: > { %s14_s17 = sadd.s32 1, %s551_s17   ;;  %s630_s15 = smov %s547_s16 }
  0xe2   : > { %p11_p5 = scmp.ge.s32.totalorder %s14_s17, 4   ;;  %s631_s16 = smov %s633_s18 }
  0xe4   :  { %13 = sbr.rel (!%p11_p5) target bundleno = 2 (0x2), region = 75 }

// kernel: openunmix_forward_pallas.10
= control target key start
LH: loop header
LB: loop body
LE: loop exit
PB: predicated region body
PF: predicated region fallthrough
CT: control target
= control target key end

     0   :  { %s646_s9 = smov 0   ;;  %s648_s10 = smov 0   ;;  %s727_s0 = inlined_call_operand.vmem [shape: f32[2,8,2,64], index: 0, kind: input, shape index: {}]   ;;  %s728_s1 = inlined_call_operand.vmem [shape: bf16[2,16,64], index: 1, kind: input, shape index: {}]   ;;  %s729_s2 = inlined_call_operand.vmem [shape: f32[2,8,2,16], index: 2, kind: output, shape index: {}]  }
   0x1   :  { %s650_s11 = smov 0  }
   0x2 LB: > { %s24_s12 = sadd.s32 1, %s612_s10  ;;  %p515_p0 = scmp.ge.s32.totalorder %s616_s11, 1  ;;  %s616_s11 = sphi %s650_s11, %s12_s11   ;;  %s612_s10 = sphi %s648_s10, %s733_s10   ;;  %s608_s9 = sphi %s646_s9, %s732_s9  }
   0x3   : > { %p26_p1 = scmp.ge.s32.totalorder %s24_s12, 2  ;;  %p167_p2 = scmp.lt.s32.totalorder %s616_s11, 3 }
   0x5   : > { %s735_s12 = smov (%p26_p1, %s24_s12), 0  ;;  %p168_p3 = pnand %p515_p0, %p167_p2 }
   0x6   : > { %p215_p4 = scmp.lt.s32.totalorder (!%p168_p3), %s608_s9, 1  ;;  %s685_s25 = smov (!%p168_p3), 0  }
   0x7   : > { %171 = sbr.rel (%p168_p3) target bundleno = 720 (0x2d0), region = 28 }
   0xc   : > { %vm256_vm0 = vcmask 123904   ;;  %v622_v0 = vmov 0.0   ;;  %s216_s13 = scalar_select %p215_p4, %s608_s9, 1 }
   0xd   : > { %257 = vst.msk [vmem:[#allocation2] sm:$0x3] %vm256_vm0, %v622_v0  ;;  %258 = vst.msk [vmem:[#allocation3] sm:$0x3] %vm256_vm0, %v622_v0 }
   0xe   : > { %s529_s14 = sshll.u32 %s216_s13, 4  ;;  %s530_s15 = sshll.u32 %s216_s13, 3 }
   0xf   : > { %s673_s18 = scalar_lea.vmem %s727_s0, %s529_s14  ;;  %s678_s21 = scalar_lea.vmem %s728_s1, %s530_s15 }
  0x10   : > { %s683_s24 = scalar_lea.vmem %s729_s2, %s529_s14 }
  0x11 LB: >> { %v581_v1 = vld [vmem:[%s678_s21] sm:$0xff]   ;;  %v623_v2 = vmov 0.0   ;;  %vm624_vm1 = vmmov 0   ;;  %vm289_vm2 = vcmask 130048   ;;  %s522_s26 = sshll.u32 %s620_s25, 1  ;;  %s625_s4 = smov 96   ;;  %s620_s25 = sphi %s685_s25, %s269_s25  }
  0x12   : >> { %534 = vmatprep.subr.bf16.mxu0 %v623_v2  ;;  %536 = vmatprep.mubr.msk.bf16.mxu0 %vm624_vm1, %v623_v2  ;;  %s271_s27 = ssub.s32 7, %s522_s26  ;;  %s626_s5 = smov 16  }
  0x13   : >> { %535 = vmatpush3.bf16.msra.mxu0 %v581_v1  ;;  %s272_s28 = smul.u32 %s608_s9, %s271_s27  ;;  %s627_s6 = smov 48  }
  0x14   : >> { %v278_v3 = vld [vmem:[#allocation2] sm:$0x3]  ;;  %v279_v12 = vld [vmem:[#allocation3] sm:$0x3]  ;;  %s628_s8 = smov 112   ;;  %s629_s13 = smov 32  }
  0x15   : >> { %v280_v4 = vpack.c.bf16 %v278_v3, %v278_v3  ;;  %s694_s29 = sadd.s32 %s620_s25, %s272_s28  ;;  %s630_s14 = smov 80  }
  0x16   : >> { %s523_s30 = sshll.u32 %s694_s29, 1  ;;  %p362_p5 = scmp.lt.s32.totalorder %s694_s29, 8 }
  0x17   : >> { %537 = vmatmul.mubr.msk.bf16.vlgmr.msra.gmra.mxu0 %vm289_vm2, %v280_v4  ;;  %s276_s3 = scalar_lea.vmem %s673_s18, %s523_s30  ;;  %s387_s15 = scalar_lea.vmem %s683_s24, %s523_s30 }
  0x18   : >> { %v277_v5 = vld [vmem:[%s276_s3] sm:$0x3]  ;;  %s363_s7 = scalar_select %p362_p5, 1, 0 }
  0x19   : >> { %s269_s25 = sadd.s32 1, %s620_s25  }
  0x1a   : >> { %v364_v20 = vstv %s363_s7  ;;  %p266_p6 = scmp.ge.s32.totalorder %s269_s25, 8  }
  0x1b   : >> { %vm701_vm3 = vcmp.eq.s32.totalorder %v364_v20, 1 }
  0xd7   : >> { %v327_v6 = vpop.f32.mrf.mxu0 }
  0xd8   : >> { %v333_v7 = vadd.f32 %v327_v6, %v277_v5 }
  0xd9   : >> { %v538_v8 = vpop.f32.mrf.mxu0 }
  0xda   : >> { %582 = vtanh.f32 %v333_v7  ;;  %v526_v13 = vmul.f32 -1.442695, %v333_v7 }
  0xdb   : >> { %v330_v9 = vpop.f32.mrf.mxu0 }
  0xdc   : >> { %584 = vpow2.f32 %v526_v13 }
  0xdd   : >> { %v539_v10 = vpop.f32.mrf.mxu0 }
  0xe7   : >> { %v583_v11 = vpop.eup %582 }
  0xe8   : >> { %347 = vrot.lane.b32.xlu0 %v583_v11, %s625_s4 }
  0xe9   : >> { %v585_v14 = vpop.eup %584 }
  0xea   : >> { %v337_v15 = vadd.f32 1.0, %v585_v14 }
  0xec   : >> { %342 = vrot.lane.b32.xlu0 %v279_v12, %s626_s5  ;;  %586 = vrcp.f32 %v337_v15 }
  0xf0   : >> { %367 = vrot.lane.b32.xlu0 %v278_v3, %s627_s6 }
  0xf9   : >> { %v587_v16 = vpop.eup %586 }
 0x15a   : >> { %v348_v17 = vpop.permute.xlu0 %347 }
 0x15b   : >> { %v350_v18 = vmul.f32 %v587_v16, %v348_v17 }
 0x15d   : >> { %352 = vrot.lane.b32.xlu1 %v350_v18, %s626_s5 }
 0x15e   : >> { %v343_v19 = vpop.permute.xlu0 %342 }
 0x15f   : >> { %v345_v21 = vmul.f32 %v587_v16, %v343_v19 }
 0x162   : >> { %v368_v27 = vpop.permute.xlu0 %367 }
 0x1cf   : >> { %v353_v22 = vpop.permute.xlu1 %352 }
 0x1d0   : >> { %v355_v24 = vadd.f32 %v353_v22, %v345_v21 }
 0x1d2   : >> { %588 = vtanh.f32 %v355_v24  ;;  %v377_v25 = vsel %vm701_vm3, %v355_v24, %v343_v19 }
 0x1d3   : >> { %379 = vrot.lane.b32.xlu0 %v377_v25, %s628_s8 }
 0x1df   : >> { %v589_v26 = vpop.eup %588 }
 0x1e0   : >> { %358 = vrot.lane.b32.xlu1 %v589_v26, %s629_s13 }
 0x245   : >> { %v380_v28 = vpop.permute.xlu0 %379 }
 0x246   : >> { %382 = vst.msk [vmem:[#allocation3] sm:$0x3] %vm256_vm0, %v380_v28 }
 0x252   : >> { %v359_v29 = vpop.permute.xlu1 %358 }
 0x253   : >> { %v361_v30 = vmul.f32 %v587_v16, %v359_v29 }
 0x255   : >> { %v370_v31 = vsel %vm701_vm3, %v361_v30, %v368_v27 }
 0x256   : >> { %372 = vrot.lane.b32.xlu1 %v370_v31, %s630_s14 }
 0x25a   : >> { %384 = vrot.lane.b32.xlu1 %v361_v30, %s630_s14 }
 0x2c8   : >> { %v373_v32 = vpop.permute.xlu1 %372 }
 0x2c9   : >> { %376 = vst.msk [vmem:[#allocation2] sm:$0x3] %vm256_vm0, %v373_v32 }
 0x2cb   : > { %268 = sbr.rel (!%p266_p6) target bundleno = 17 (0x11), region = 74 }
 0x2cc   : >> { %v385_v33 = vpop.permute.xlu1 %384 }
 0x2cd   : >> { %388 = vst.msk [vmem:[%s387_s15] sm:$0x3] %vm256_vm0, %v385_v33 }
 0x2d0 PF: > { %s12_s11 = sadd.s32 1, %s616_s11   ;;  %s732_s9 = smov %s612_s10 }
 0x2d1   : > { %p9_p7 = scmp.ge.s32.totalorder %s12_s11, 4   ;;  %s733_s10 = smov %s735_s12 }
 0x2d3   :  { %11 = sbr.rel (!%p9_p7) target bundleno = 2 (0x2), region = 85 }

// kernel: openunmix_forward_pallas.14
= control target key start
LH: loop header
LB: loop body
LE: loop exit
PB: predicated region body
PF: predicated region fallthrough
CT: control target
= control target key end

     0   :  { %v129_v0 = vmov 0.0   ;;  %vm130_vm0 = vmmov 0   ;;  %vm37_vm1 = vcmask 261120   ;;  %vm102_vm2 = vcmask 392192   ;;  %s180_s1 = inlined_call_operand.vmem [shape: bf16[1,32,48], index: 1, kind: input, shape index: {}]   ;;  %s181_s0 = inlined_call_operand.vmem [shape: f32[1,16,32], index: 0, kind: input, shape index: {}]   ;;  %s182_s2 = inlined_call_operand.vmem [shape: f32[1,1,48], index: 2, kind: input, shape index: {}]   ;;  %s183_s3 = inlined_call_operand.vmem [shape: f32[1,1,48], index: 3, kind: input, shape index: {}]   ;;  %s184_s4 = inlined_call_operand.vmem [shape: f32[1,16,48], index: 4, kind: output, shape index: {}]  }
   0x1   :  { %117 = vmatprep.subr.bf16.mxu0 %v129_v0  ;;  %v127_v1 = vld [vmem:[%s180_s1 + $0x8] sm:$0xff]   ;;  %121 = vmatprep.mubr.msk.bf16.mxu0 %vm130_vm0, %v129_v0  ;;  %v128_v2 = vld [vmem:[%s180_s1] sm:$0xff]  }
   0x2   :  { %118 = vmatpush3.bf16.msra.mxu0 %v127_v1  ;;  %v18_v3 = vld [vmem:[%s181_s0] sm:$0xff]  ;;  %v19_v4 = vld [vmem:[%s181_s0 + $0x8] sm:$0xff] }
   0x3   :  { %119 = vmatprep.subr.bf16.mxu0 %v129_v0  ;;  %v20_v5 = vpack.c.bf16 %v19_v4, %v18_v3  ;;  %v112_v6 = vld [vmem:[%s182_s2] ss:$0 sm:$0xff] }
   0x4   :  { %v113_v8 = vld [vmem:[%s183_s3] ss:$0 sm:$0xff] }
   0x6   :  { %120 = vmatpush3.bf16.msra.mxu0 %v128_v2 }
   0x9   :  { %122 = vmatmul.mubr.msk.bf16.vlgmr.msra.gmra.mxu0 %vm37_vm1, %v20_v5 }
  0xc9   :  { %v75_v7 = vpop.f32.mrf.mxu0 }
  0xca   :  { %v89_v9 = vmul.f32 %v112_v6, %v75_v7 }
  0xcb   :  { %v123_v10 = vpop.f32.mrf.mxu0 }
  0xcc   :  { %v98_v11 = vadd.f32 %v113_v8, %v89_v9 }
  0xcd   :  { %v78_v12 = vpop.f32.mrf.mxu0 }
  0xce   :  { %v100_v13 = vmax.f32 %v98_v11, 0.0  ;;  %v90_v14 = vmul.f32 %v112_v6, %v78_v12 }
  0xcf   :  { %v124_v15 = vpop.f32.mrf.mxu0 }
  0xd0   :  { %103 = vst.msk [vmem:[%s184_s4] sm:$0xff] %vm102_vm2, %v100_v13  ;;  %v99_v16 = vadd.f32 %v113_v8, %v90_v14 }
  0xd2   :  { %v101_v17 = vmax.f32 %v99_v16, 0.0 }
  0xd4   :  { %104 = vst.msk [vmem:[%s184_s4 + $0x8] sm:$0xff] %vm102_vm2, %v101_v17 }

// kernel: openunmix_forward_pallas.13
= control target key start
LH: loop header
LB: loop body
LE: loop exit
PB: predicated region body
PF: predicated region fallthrough
CT: control target
= control target key end

     0   :  { %v280_v0 = vmov 0.0   ;;  %vm281_vm0 = vmmov 0   ;;  %vm51_vm1 = vcmask 130048   ;;  %vm108_vm2 = vcmask 261120   ;;  %s377_s4 = inlined_call_operand.vmem [shape: bf16[1,16,32], index: 4, kind: input, shape index: {}]   ;;  %s378_s3 = inlined_call_operand.vmem [shape: bf16[1,32,32], index: 3, kind: input, shape index: {}]   ;;  %s379_s1 = inlined_call_operand.vmem [shape: f32[2,16,16], index: 1, kind: input, shape index: {}, may-alias: {1,2}]   ;;  %s380_s5 = inlined_call_operand.vmem [shape: bf16[1,16,32], index: 5, kind: input, shape index: {}]   ;;  %s381_s0 = inlined_call_operand.vmem [shape: f32[1,16,32], index: 0, kind: input, shape index: {}]   ;;  %s382_s2 = inlined_call_operand.vmem [shape: f32[2,16,16], index: 2, kind: input, shape index: {}, may-alias: {1,2}]   ;;  %s383_s6 = inlined_call_operand.vmem [shape: f32[1,1,32], index: 6, kind: input, shape index: {}]   ;;  %s384_s7 = inlined_call_operand.vmem [shape: f32[1,1,32], index: 7, kind: input, shape index: {}]   ;;  %s385_s8 = inlined_call_operand.vmem [shape: f32[1,16,32], index: 8, kind: output, shape index: {}]  }
   0x1   :  { %254 = vmatprep.subr.bf16.mxu0 %v280_v0  ;;  %260 = vmatprep.subr.bf16.mxu1 %v280_v0  ;;  %v276_v1 = vld [vmem:[%s377_s4] sm:$0xff]   ;;  %v277_v2 = vld [vmem:[%s378_s3 + $0x8] sm:$0xff]   ;;  %v241_v11 = vld [vmem:[%s382_s2 + $0x10] sm:$0xff] }
   0x2   :  { %256 = vmatprep.mubr.msk.bf16.mxu0 %vm281_vm0, %v280_v0  ;;  %264 = vmatprep.mubr.msk.bf16.mxu1 %vm281_vm0, %v280_v0  ;;  %v40_v3 = vld [vmem:[%s379_s1] sm:$0xff]  ;;  %v41_v4 = vld [vmem:[%s379_s1 + $0x8] sm:$0xff]  ;;  %v242_v12 = vld [vmem:[%s382_s2 + $0x18] sm:$0xff] }
   0x3   :  { %255 = vmatpush3.bf16.msra.mxu0 %v276_v1  ;;  %261 = vmatpush3.bf16.msra.mxu1 %v277_v2  ;;  %v42_v5 = vpack.c.bf16 %v41_v4, %v40_v3  ;;  %v278_v6 = vld [vmem:[%s378_s3] sm:$0xff]   ;;  %v34_v9 = vld [vmem:[%s381_s0 + $0x8] sm:$0xff]  ;;  %v155_v13 = vpack.c.bf16 %v242_v12, %v241_v11 }
   0x4   :  { %268 = vmatprep.subr.bf16.mxu0 %v280_v0  ;;  %262 = vmatprep.subr.bf16.mxu1 %v280_v0  ;;  %v279_v7 = vld [vmem:[%s380_s5] sm:$0xff]  }
   0x5   :  { %v33_v8 = vld [vmem:[%s381_s0] sm:$0xff] }
   0x6   :  { %257 = vmatmul.mubr.msk.bf16.vlgmr.msra.gmra.mxu0 %vm51_vm1, %v42_v5  ;;  %v35_v10 = vpack.c.bf16 %v34_v9, %v33_v8  ;;  %v245_v22 = vld [vmem:[%s383_s6] ss:$0 sm:$0xff] }
   0x7   :  { %269 = vmatpush3.bf16.msra.mxu0 %v279_v7  ;;  %270 = vmatprep.mubr.msk.bf16.mxu0 %vm281_vm0, %v280_v0  ;;  %v246_v25 = vld [vmem:[%s384_s7] ss:$0 sm:$0xff] }
   0x8   :  { %263 = vmatpush3.bf16.msra.mxu1 %v278_v6 }
   0xb   :  { %265 = vmatmul.mubr.msk.bf16.vlgmr.msra.gmra.mxu1 %vm108_vm2, %v35_v10 }
   0xe   :  { %271 = vmatmul.mubr.msk.bf16.vlgmr.msra.gmra.mxu0 %vm51_vm1, %v155_v13 }
  0xc6   :  { %v89_v14 = vpop.f32.mrf.mxu0 }
  0xc8   :  { %v258_v15 = vpop.f32.mrf.mxu0 }
  0xca   :  { %v92_v16 = vpop.f32.mrf.mxu0 }
  0xcb   :  { %v146_v17 = vpop.f32.mrf.mxu1 }
  0xcc   :  { %v259_v18 = vpop.f32.mrf.mxu0  ;;  %v147_v19 = vadd.f32 %v146_v17, %v89_v14 }
  0xcd   :  { %v266_v20 = vpop.f32.mrf.mxu1 }
  0xce   :  { %v201_v21 = vpop.f32.mrf.mxu0 }
  0xcf   :  { %v149_v23 = vpop.f32.mrf.mxu1  ;;  %v208_v24 = vadd.f32 %v201_v21, %v147_v19 }
  0xd0   :  { %v272_v26 = vpop.f32.mrf.mxu0  ;;  %v150_v27 = vadd.f32 %v149_v23, %v92_v16 }
  0xd1   :  { %v217_v28 = vmul.f32 %v245_v22, %v208_v24  ;;  %v267_v29 = vpop.f32.mrf.mxu1 }
  0xd2   :  { %v204_v30 = vpop.f32.mrf.mxu0 }
  0xd3   :  { %v226_v31 = vadd.f32 %v246_v25, %v217_v28  ;;  %v209_v32 = vadd.f32 %v204_v30, %v150_v27 }
  0xd4   :  { %v273_v33 = vpop.f32.mrf.mxu0 }
  0xd5   :  { %v228_v34 = vmax.f32 %v226_v31, 0.0  ;;  %v218_v35 = vmul.f32 %v245_v22, %v209_v32 }
  0xd7   :  { %230 = vst.msk [vmem:[%s385_s8] sm:$0xff] %vm108_vm2, %v228_v34  ;;  %v227_v36 = vadd.f32 %v246_v25, %v218_v35 }
  0xd9   :  { %v229_v37 = vmax.f32 %v227_v36, 0.0 }
  0xdb   :  { %231 = vst.msk [vmem:[%s385_s8 + $0x8] sm:$0xff] %vm108_vm2, %v229_v37 }

// kernel: openunmix_forward_pallas.15
= control target key start
LH: loop header
LB: loop body
LE: loop exit
PB: predicated region body
PF: predicated region fallthrough
CT: control target
= control target key end

     0   :  { %s286_s9 = smov 0   ;;  %s300_s0 = inlined_call_operand.vmem [shape: f32[4,24,8], index: 0, kind: input, shape index: {}]   ;;  %s301_s1 = inlined_call_operand.vmem [shape: f32[4,24,8], index: 1, kind: input, shape index: {}]   ;;  %s302_s2 = inlined_call_operand.vmem [shape: f32[4,24,8], index: 2, kind: output, shape index: {}]  }
   0x1 LB: > { %s244_s10 = sadd.s32 4294967295, %s269_s9   ;;  %p248_p0 = scmp.ge.s32.totalorder %s269_s9, 1  ;;  %s269_s9 = sphi %s286_s9, %s12_s9  }
   0x2   : > { %p122_p1 = scmp.lt.s32.totalorder %s269_s9, 5 }
   0x4   : > { %p123_p2 = pnand %p248_p0, %p122_p1 }
   0x5   : > { %p149_p3 = scmp.lt.s32.totalorder (!%p123_p2), %s244_s10, 3 }
   0x6   : > { %126 = sbr.rel (%p123_p2) target bundleno = 21 (0x15), region = 28 }
   0xb   : > { %s304_s10 = smov (!%p149_p3, %s244_s10), 3  ;;  %vm173_vm0 = vcmask 64512  }
   0xc   : > { %s254_s11 = smul.u32 24, %s304_s10 }
   0xe   : > { %s153_s14 = scalar_lea.vmem %s300_s0, %s254_s11  ;;  %s158_s17 = scalar_lea.vmem %s301_s1, %s254_s11 }
   0xf   : > { %s163_s20 = scalar_lea.vmem %s302_s2, %s254_s11  ;;  %v164_v0 = vld [vmem:[%s153_s14] sm:$0xff]  ;;  %v165_v2 = vld [vmem:[%s153_s14 + $0x8] sm:$0xff]  ;;  %v166_v5 = vld [vmem:[%s153_s14 + $0x10] sm:$0xff] }
  0x10   : > { %v167_v1 = vld [vmem:[%s158_s17] sm:$0xff]  ;;  %v168_v4 = vld [vmem:[%s158_s17 + $0x8] sm:$0xff]  ;;  %v169_v6 = vld [vmem:[%s158_s17 + $0x10] sm:$0xff] }
  0x11   : > { %v170_v3 = vmul.f32 %v167_v1, %v164_v0  ;;  %v171_v7 = vmul.f32 %v168_v4, %v165_v2  ;;  %v172_v8 = vmul.f32 %v169_v6, %v166_v5 }
  0x13   : > { %174 = vst.msk [vmem:[%s163_s20] sm:$0xff] %vm173_vm0, %v170_v3  ;;  %175 = vst.msk [vmem:[%s163_s20 + $0x8] sm:$0xff] %vm173_vm0, %v171_v7 }
  0x14   : > { %176 = vst.msk [vmem:[%s163_s20 + $0x10] sm:$0xff] %vm173_vm0, %v172_v8 }
  0x15 PF: > { %s12_s9 = sadd.s32 1, %s269_s9  }
  0x16   : > { %p9_p4 = scmp.ge.s32.totalorder %s12_s9, 6  }
  0x18   :  { %11 = sbr.rel (!%p9_p4) target bundleno = 1 (0x1), region = 61 }

</bundles_post_ra>
